<compile_context>
chip_gen: v5e
topology: v5e:2x2
jax: 0.10.0
libtpu: 0.0.40
codegen_flags: <defaults>
</compile_context>

<pallas_src>
import jax
import jax.numpy as jnp
from jax.experimental import pallas as pl
from jax.experimental.pallas import tpu as pltpu

ADD_EPS = 1e-12   # Add() epsilon
LN_EPS = 1e-5     # nn.LayerNorm default eps


# ----------------------------- in-kernel helpers -----------------------------

def _erf(x):
    # Abramowitz & Stegun 7.1.26 rational approximation, |err| <= 1.5e-7.
    p = 0.3275911
    a1, a2, a3, a4, a5 = (0.254829592, -0.284496736, 1.421413741,
                          -1.453152027, 1.061405429)
    ax = jnp.abs(x)
    t = 1.0 / (1.0 + p * ax)
    poly = ((((a5 * t + a4) * t + a3) * t + a2) * t + a1) * t
    y = 1.0 - poly * jnp.exp(-ax * ax)
    return jnp.where(x >= 0.0, y, -y)


def _gelu_exact(x):
    # nn.GELU() default (erf form).
    return 0.5 * x * (1.0 + _erf(x * 0.7071067811865475))


def _layernorm(x, gamma, beta):
    mu = jnp.mean(x, axis=-1, keepdims=True)
    xc = x - mu
    var = jnp.mean(xc * xc, axis=-1, keepdims=True)
    return xc * jax.lax.rsqrt(var + LN_EPS) * gamma + beta


def _weighted_add(w_ref, a, b):
    # Add(): relu(w) / (sum(relu(w)) + eps); scalar math from SMEM.
    w0 = jnp.maximum(w_ref[0], 0.0)
    w1 = jnp.maximum(w_ref[1], 0.0)
    inv = 1.0 / (w0 + w1 + ADD_EPS)
    return (w0 * inv) * a + (w1 * inv) * b


# --------------------------------- kernel ------------------------------------

def _ba_ffn_kernel(
    w_add1_ref, w_add2_ref,          # SMEM (2,) raw fusion weights
    x_ref,                           # (N, C) input slab, channels-last
    g1_ref, beta1_ref,               # (1, C) LayerNorm1 affine
    wq_ref, bq_ref,                  # (1, C), (1, 1)   query projection
    wk_ref, bk_ref,                  # (C, C), (1, C)   key projection
    wv_ref, bv_ref,                  # (C, C), (1, C)   value projection
    wp_ref, bp_ref,                  # (C, C), (1, C)   attention out-proj
    g2_ref, beta2_ref,               # (1, C) LayerNorm2 affine
    wf1_ref, bf1_ref,                # (C, F), (1, F)   FFN expand
    wf2_ref, bf2_ref,                # (F, C), (1, C)   FFN contract
    o_ref,                           # (N, C) output slab
):
    x = x_ref[...]

    # ---- norm1 (over channel dim) ----
    xn = _layernorm(x, g1_ref[...], beta1_ref[...])

    # ---- BroadcastAttention (num_heads == 1) ----
    # query: (N, 1); softmax over the sequence axis.
    q = jnp.sum(xn * wq_ref[...], axis=-1, keepdims=True) + bq_ref[...]
    q_max = jnp.max(q, axis=0, keepdims=True)
    e = jnp.exp(q - q_max)
    scores = e / jnp.sum(e, axis=0, keepdims=True)                  # (N, 1)

    k = jnp.dot(xn, wk_ref[...], preferred_element_type=jnp.float32) + bk_ref[...]
    v = jnp.dot(xn, wv_ref[...], preferred_element_type=jnp.float32) + bv_ref[...]

    ctx = jnp.sum(k * scores, axis=0, keepdims=True)                # (1, C)
    attn = jnp.maximum(v, 0.0) * ctx                                # (N, C)
    attn = jnp.dot(attn, wp_ref[...],
                   preferred_element_type=jnp.float32) + bp_ref[...]

    # ---- add1: weighted residual fusion ----
    x1 = _weighted_add(w_add1_ref, attn, x)

    # ---- norm2 ----
    xn2 = _layernorm(x1, g2_ref[...], beta2_ref[...])

    # ---- FFN: Conv1d(k=1) -> GELU -> Conv1d(k=1) ----
    h = jnp.dot(xn2, wf1_ref[...], preferred_element_type=jnp.float32) + bf1_ref[...]
    h = _gelu_exact(h)
    f = jnp.dot(h, wf2_ref[...], preferred_element_type=jnp.float32) + bf2_ref[...]

    # ---- add2: weighted residual fusion ----
    o_ref[...] = _weighted_add(w_add2_ref, f, x1)


# -------------------------------- wrapper ------------------------------------

def ba_ffn_block(x_bcn, params):
    """x_bcn: (B, C, N) float32 (PyTorch Conv1d layout). Returns (B, C, N)."""
    B, C, N = x_bcn.shape

    x_bnc = jnp.transpose(x_bcn, (0, 2, 1))      # channels-last, lane-dense

    dense_args = [
        params["ln1_gamma"], params["ln1_beta"],
        params["w_q"], params["b_q"],
        params["w_k"], params["b_k"],
        params["w_v"], params["b_v"],
        params["w_proj"], params["b_proj"],
        params["ln2_gamma"], params["ln2_beta"],
        params["w_ffn1"], params["b_ffn1"],
        params["w_ffn2"], params["b_ffn2"],
    ]

    def _replicated(arr):
        nd = arr.ndim
        return pl.BlockSpec(arr.shape, lambda b, _nd=nd: (0,) * _nd)

    smem_spec = pl.BlockSpec(memory_space=pltpu.MemorySpace.SMEM)
    slab_spec = pl.BlockSpec((None, N, C), lambda b: (b, 0, 0))

    in_specs = [smem_spec, smem_spec, slab_spec] + [_replicated(a) for a in dense_args]

    out = pl.pallas_call(
        _ba_ffn_kernel,
        out_shape=jax.ShapeDtypeStruct((B, N, C), x_bcn.dtype),
        grid_spec=pltpu.PrefetchScalarGridSpec(
            num_scalar_prefetch=0,
            grid=(B,),                                   # >=2 steps -> feeds both v7x TCs
            in_specs=in_specs,
            out_specs=pl.BlockSpec((None, N, C), lambda b: (b, 0, 0)),
        ),
        compiler_params=pltpu.CompilerParams(
            dimension_semantics=("parallel",)),
    )(params["w_add1"], params["w_add2"], x_bnc, *dense_args)

    return jnp.transpose(out, (0, 2, 1))                 # back to (B, C, N)


# ---------------------------------- demo -------------------------------------

if __name__ == "__main__":
    B, C, N = 2, 32, 64          # batch, dim, sequence length
    FFN = 64                     # ffn_dim
    HD = C                       # head_dim (num_heads == 1)

    keys = jax.random.split(jax.random.PRNGKey(0), 13)

    def rnd(k, shape, scale):
        return scale * jax.random.normal(k, shape, dtype=jnp.float32)

    # Parameters in PyTorch layout (out_channels, in_channels) for Conv1d(k=1).
    w_qkv = rnd(keys[0], (1 + 2 * HD, C), 0.15)
    b_qkv = rnd(keys[1], (1 + 2 * HD,), 0.05)
    w_proj = rnd(keys[2], (C, C), 0.15)
    b_proj = rnd(keys[3], (C,), 0.05)
    w_f1 = rnd(keys[4], (FFN, C), 0.15)
    b_f1 = rnd(keys[5], (FFN,), 0.05)
    w_f2 = rnd(keys[6], (C, FFN), 0.15)
    b_f2 = rnd(keys[7], (C,), 0.05)
    ln1_g = 1.0 + rnd(keys[8], (C,), 0.05)
    ln1_b = rnd(keys[9], (C,), 0.05)
    ln2_g = 1.0 + rnd(keys[10], (C,), 0.05)
    ln2_b = rnd(keys[11], (C,), 0.05)
    w_add1 = jnp.ones((2,), jnp.float32)   # Add() init: torch.ones(2)
    w_add2 = jnp.ones((2,), jnp.float32)

    x = jax.random.normal(keys[12], (B, C, N), dtype=jnp.float32)

    # Kernel-side parameter packing (pre-transposed for lane-dense row @ W matmuls;
    # qkv rows split exactly as torch.split([1, head_dim, head_dim], dim=2)).
    params = dict(
        w_add1=w_add1, w_add2=w_add2,
        ln1_gamma=ln1_g.reshape(1, C), ln1_beta=ln1_b.reshape(1, C),
        w_q=w_qkv[0:1, :],                         # (1, C)
        b_q=b_qkv[0:1].reshape(1, 1),
        w_k=jnp.transpose(w_qkv[1:1 + HD, :]),     # (C, HD)
        b_k=b_qkv[1:1 + HD].reshape(1, HD),
        w_v=jnp.transpose(w_qkv[1 + HD:, :]),      # (C, HD)
        b_v=b_qkv[1 + HD:].reshape(1, HD),
        w_proj=jnp.transpose(w_proj), b_proj=b_proj.reshape(1, C),
        ln2_gamma=ln2_g.reshape(1, C), ln2_beta=ln2_b.reshape(1, C),
        w_ffn1=jnp.transpose(w_f1), b_ffn1=b_f1.reshape(1, FFN),
        w_ffn2=jnp.transpose(w_f2), b_ffn2=b_f2.reshape(1, C),
    )

    out = jax.block_until_ready(ba_ffn_block(x, params))

    # ---------------- pure-JAX reference (mirrors the PyTorch graph) ----------
    def reference(x):
        def add_w(w, a, b):
            wr = jnp.maximum(w, 0.0)
            wt = wr / (jnp.sum(wr) + ADD_EPS)
            return wt[0] * a + wt[1] * b

        def layernorm_cn(x, g, b):          # x: (B, C, N); normalize over C
            xt = jnp.transpose(x, (0, 2, 1))
            mu = jnp.mean(xt, -1, keepdims=True)
            var = jnp.mean((xt - mu) ** 2, -1, keepdims=True)
            y = (xt - mu) / jnp.sqrt(var + LN_EPS) * g + b
            return jnp.transpose(y, (0, 2, 1))

        def conv1(x, W, b):                 # Conv1d with kernel size 1
            return jnp.einsum("oc,bcn->bon", W, x) + b[None, :, None]

        xn = layernorm_cn(x, ln1_g, ln1_b)
        qkv = conv1(xn, w_qkv, b_qkv)                          # (B, 1+2HD, N)
        q, k, v = qkv[:, 0:1], qkv[:, 1:1 + HD], qkv[:, 1 + HD:]
        scores = jax.nn.softmax(q, axis=-1)
        ctx = jnp.sum(k * scores, axis=-1, keepdims=True)
        attn = jnp.maximum(v, 0.0) * ctx
        attn = conv1(attn, w_proj, b_proj)
        x1 = add_w(w_add1, attn, x)
        xn2 = layernorm_cn(x1, ln2_g, ln2_b)
        h = jax.nn.gelu(conv1(xn2, w_f1, b_f1), approximate=False)
        f = conv1(h, w_f2, b_f2)
        return add_w(w_add2, f, x1)

    ref = jax.block_until_ready(reference(x))
    assert out.shape == ref.shape == (B, C, N)
    assert jnp.allclose(out, ref, atol=1e-2, rtol=1e-2), \
        float(jnp.max(jnp.abs(out - ref)))

    print("KERNEL_OK")
</pallas_src>

<mosaic_0001>
module attributes {stable_mosaic.version = 11 : i64} {
  func.func @_ba_ffn_kernel(%arg0: i32, %arg1: memref<2xf32, #tpu.memory_space<smem>>, %arg2: memref<2xf32, #tpu.memory_space<smem>>, %arg3: memref<1x64x32xf32, #tpu.memory_space<vmem>>, %arg4: memref<1x32xf32, #tpu.memory_space<vmem>>, %arg5: memref<1x32xf32, #tpu.memory_space<vmem>>, %arg6: memref<1x32xf32, #tpu.memory_space<vmem>>, %arg7: memref<1x1xf32, #tpu.memory_space<vmem>>, %arg8: memref<32x32xf32, #tpu.memory_space<vmem>>, %arg9: memref<1x32xf32, #tpu.memory_space<vmem>>, %arg10: memref<32x32xf32, #tpu.memory_space<vmem>>, %arg11: memref<1x32xf32, #tpu.memory_space<vmem>>, %arg12: memref<32x32xf32, #tpu.memory_space<vmem>>, %arg13: memref<1x32xf32, #tpu.memory_space<vmem>>, %arg14: memref<1x32xf32, #tpu.memory_space<vmem>>, %arg15: memref<1x32xf32, #tpu.memory_space<vmem>>, %arg16: memref<32x64xf32, #tpu.memory_space<vmem>>, %arg17: memref<1x64xf32, #tpu.memory_space<vmem>>, %arg18: memref<64x32xf32, #tpu.memory_space<vmem>>, %arg19: memref<1x32xf32, #tpu.memory_space<vmem>>, %arg20: memref<1x64x32xf32, #tpu.memory_space<vmem>>) attributes {dimension_semantics = [#tpu.dimension_semantics<parallel>], iteration_bounds = array<i64: 2>, scalar_prefetch = 0 : i64, scratch_operands = 0 : i64, tpu.core_type = #tpu.core_type<tc>, window_params = [{transform_indices = @transform_0, window_bounds = array<i64: 2>}, {transform_indices = @transform_1, window_bounds = array<i64: 2>}, {transform_indices = @transform_2, window_bounds = array<i64: 1, 64, 32>}, {pipeline_mode = #tpu.pipeline_mode<synchronous>, transform_indices = @transform_3, window_bounds = array<i64: 1, 32>}, {pipeline_mode = #tpu.pipeline_mode<synchronous>, transform_indices = @transform_4, window_bounds = array<i64: 1, 32>}, {pipeline_mode = #tpu.pipeline_mode<synchronous>, transform_indices = @transform_5, window_bounds = array<i64: 1, 32>}, {pipeline_mode = #tpu.pipeline_mode<synchronous>, transform_indices = @transform_6, window_bounds = array<i64: 1, 1>}, {pipeline_mode = #tpu.pipeline_mode<synchronous>, transform_indices = @transform_7, window_bounds = array<i64: 32, 32>}, {pipeline_mode = #tpu.pipeline_mode<synchronous>, transform_indices = @transform_8, window_bounds = array<i64: 1, 32>}, {pipeline_mode = #tpu.pipeline_mode<synchronous>, transform_indices = @transform_9, window_bounds = array<i64: 32, 32>}, {pipeline_mode = #tpu.pipeline_mode<synchronous>, transform_indices = @transform_10, window_bounds = array<i64: 1, 32>}, {pipeline_mode = #tpu.pipeline_mode<synchronous>, transform_indices = @transform_11, window_bounds = array<i64: 32, 32>}, {pipeline_mode = #tpu.pipeline_mode<synchronous>, transform_indices = @transform_12, window_bounds = array<i64: 1, 32>}, {pipeline_mode = #tpu.pipeline_mode<synchronous>, transform_indices = @transform_13, window_bounds = array<i64: 1, 32>}, {pipeline_mode = #tpu.pipeline_mode<synchronous>, transform_indices = @transform_14, window_bounds = array<i64: 1, 32>}, {pipeline_mode = #tpu.pipeline_mode<synchronous>, transform_indices = @transform_15, window_bounds = array<i64: 32, 64>}, {pipeline_mode = #tpu.pipeline_mode<synchronous>, transform_indices = @transform_16, window_bounds = array<i64: 1, 64>}, {pipeline_mode = #tpu.pipeline_mode<synchronous>, transform_indices = @transform_17, window_bounds = array<i64: 64, 32>}, {pipeline_mode = #tpu.pipeline_mode<synchronous>, transform_indices = @transform_18, window_bounds = array<i64: 1, 32>}, {transform_indices = @transform_19, window_bounds = array<i64: 1, 64, 32>}]} {
    %c0 = arith.constant 0 : index
    %c0_0 = arith.constant 0 : index
    %c0_1 = arith.constant 0 : index
    %0 = vector.load %arg3[%c0, %c0_0, %c0_1] : memref<1x64x32xf32, #tpu.memory_space<vmem>>, vector<1x64x32xf32>
    %1 = vector.shape_cast %0 : vector<1x64x32xf32> to vector<64x32xf32>
    %c0_2 = arith.constant 0 : index
    %c0_3 = arith.constant 0 : index
    %2 = vector.load %arg4[%c0_2, %c0_3] : memref<1x32xf32, #tpu.memory_space<vmem>>, vector<1x32xf32>
    %c0_4 = arith.constant 0 : index
    %c0_5 = arith.constant 0 : index
    %3 = vector.load %arg5[%c0_4, %c0_5] : memref<1x32xf32, #tpu.memory_space<vmem>>, vector<1x32xf32>
    %cst = arith.constant dense<0.000000e+00> : vector<64xf32>
    %4 = vector.multi_reduction <add>, %1, %cst [1] : vector<64x32xf32> to vector<64xf32>
    %5 = vector.shape_cast %4 : vector<64xf32> to vector<64x1xf32>
    %cst_6 = arith.constant 3.200000e+01 : f32
    %6 = vector.broadcast %cst_6 : f32 to vector<64x1xf32>
    %7 = arith.divf %5, %6 : vector<64x1xf32>
    %8 = vector.broadcast %7 : vector<64x1xf32> to vector<64x32xf32>
    %9 = arith.subf %1, %8 : vector<64x32xf32>
    %10 = arith.mulf %9, %9 : vector<64x32xf32>
    %cst_7 = arith.constant dense<0.000000e+00> : vector<64xf32>
    %11 = vector.multi_reduction <add>, %10, %cst_7 [1] : vector<64x32xf32> to vector<64xf32>
    %12 = vector.shape_cast %11 : vector<64xf32> to vector<64x1xf32>
    %cst_8 = arith.constant 3.200000e+01 : f32
    %13 = vector.broadcast %cst_8 : f32 to vector<64x1xf32>
    %14 = arith.divf %12, %13 : vector<64x1xf32>
    %cst_9 = arith.constant 9.99999974E-6 : f32
    %15 = vector.broadcast %cst_9 : f32 to vector<64x1xf32>
    %16 = arith.addf %14, %15 : vector<64x1xf32>
    %17 = math.rsqrt %16 : vector<64x1xf32>
    %18 = vector.broadcast %17 : vector<64x1xf32> to vector<64x32xf32>
    %19 = arith.mulf %9, %18 : vector<64x32xf32>
    %20 = vector.broadcast %2 : vector<1x32xf32> to vector<64x32xf32>
    %21 = arith.mulf %19, %20 : vector<64x32xf32>
    %22 = vector.broadcast %3 : vector<1x32xf32> to vector<64x32xf32>
    %23 = arith.addf %21, %22 : vector<64x32xf32>
    %c0_10 = arith.constant 0 : index
    %c0_11 = arith.constant 0 : index
    %24 = vector.load %arg6[%c0_10, %c0_11] : memref<1x32xf32, #tpu.memory_space<vmem>>, vector<1x32xf32>
    %25 = vector.broadcast %24 : vector<1x32xf32> to vector<64x32xf32>
    %26 = arith.mulf %23, %25 : vector<64x32xf32>
    %cst_12 = arith.constant dense<0.000000e+00> : vector<64xf32>
    %27 = vector.multi_reduction <add>, %26, %cst_12 [1] : vector<64x32xf32> to vector<64xf32>
    %28 = vector.shape_cast %27 : vector<64xf32> to vector<64x1xf32>
    %c0_13 = arith.constant 0 : index
    %c0_14 = arith.constant 0 : index
    %29 = vector.load %arg7[%c0_13, %c0_14] : memref<1x1xf32, #tpu.memory_space<vmem>>, vector<1x1xf32>
    %30 = vector.broadcast %29 : vector<1x1xf32> to vector<64x1xf32>
    %31 = arith.addf %28, %30 : vector<64x1xf32>
    %cst_15 = arith.constant dense<0xFF800000> : vector<1xf32>
    %32 = vector.multi_reduction <maximumf>, %31, %cst_15 [0] : vector<64x1xf32> to vector<1xf32>
    %33 = vector.shape_cast %32 : vector<1xf32> to vector<1x1xf32>
    %34 = vector.broadcast %33 : vector<1x1xf32> to vector<64x1xf32>
    %35 = arith.subf %31, %34 : vector<64x1xf32>
    %36 = math.exp %35 : vector<64x1xf32>
    %cst_16 = arith.constant dense<0.000000e+00> : vector<1xf32>
    %37 = vector.multi_reduction <add>, %36, %cst_16 [0] : vector<64x1xf32> to vector<1xf32>
    %38 = vector.shape_cast %37 : vector<1xf32> to vector<1x1xf32>
    %39 = vector.broadcast %38 : vector<1x1xf32> to vector<64x1xf32>
    %40 = arith.divf %36, %39 : vector<64x1xf32>
    %c0_17 = arith.constant 0 : index
    %c0_18 = arith.constant 0 : index
    %41 = vector.load %arg8[%c0_17, %c0_18] : memref<32x32xf32, #tpu.memory_space<vmem>>, vector<32x32xf32>
    %cst_19 = arith.constant dense<0.000000e+00> : vector<64x32xf32>
    %42 = tpu.matmul %23, %41, %cst_19 {dimension_numbers = #tpu.dot_dimension_numbers<[1], [0], [0], [1], [0, 0, 1, 1], [], []>} : vector<64x32xf32>, vector<32x32xf32>, vector<64x32xf32> -> vector<64x32xf32>
    %c0_20 = arith.constant 0 : index
    %c0_21 = arith.constant 0 : index
    %43 = vector.load %arg9[%c0_20, %c0_21] : memref<1x32xf32, #tpu.memory_space<vmem>>, vector<1x32xf32>
    %44 = vector.broadcast %43 : vector<1x32xf32> to vector<64x32xf32>
    %45 = arith.addf %42, %44 : vector<64x32xf32>
    %c0_22 = arith.constant 0 : index
    %c0_23 = arith.constant 0 : index
    %46 = vector.load %arg10[%c0_22, %c0_23] : memref<32x32xf32, #tpu.memory_space<vmem>>, vector<32x32xf32>
    %cst_24 = arith.constant dense<0.000000e+00> : vector<64x32xf32>
    %47 = tpu.matmul %23, %46, %cst_24 {dimension_numbers = #tpu.dot_dimension_numbers<[1], [0], [0], [1], [0, 0, 1, 1], [], []>} : vector<64x32xf32>, vector<32x32xf32>, vector<64x32xf32> -> vector<64x32xf32>
    %c0_25 = arith.constant 0 : index
    %c0_26 = arith.constant 0 : index
    %48 = vector.load %arg11[%c0_25, %c0_26] : memref<1x32xf32, #tpu.memory_space<vmem>>, vector<1x32xf32>
    %49 = vector.broadcast %48 : vector<1x32xf32> to vector<64x32xf32>
    %50 = arith.addf %47, %49 : vector<64x32xf32>
    %51 = vector.broadcast %40 : vector<64x1xf32> to vector<64x32xf32>
    %52 = arith.mulf %45, %51 : vector<64x32xf32>
    %cst_27 = arith.constant dense<0.000000e+00> : vector<32xf32>
    %53 = vector.multi_reduction <add>, %52, %cst_27 [0] : vector<64x32xf32> to vector<32xf32>
    %54 = vector.shape_cast %53 : vector<32xf32> to vector<1x32xf32>
    %cst_28 = arith.constant 0.000000e+00 : f32
    %55 = vector.broadcast %cst_28 : f32 to vector<64x32xf32>
    %56 = arith.maximumf %50, %55 : vector<64x32xf32>
    %57 = vector.broadcast %54 : vector<1x32xf32> to vector<64x32xf32>
    %58 = arith.mulf %56, %57 : vector<64x32xf32>
    %c0_29 = arith.constant 0 : index
    %c0_30 = arith.constant 0 : index
    %59 = vector.load %arg12[%c0_29, %c0_30] : memref<32x32xf32, #tpu.memory_space<vmem>>, vector<32x32xf32>
    %cst_31 = arith.constant dense<0.000000e+00> : vector<64x32xf32>
    %60 = tpu.matmul %58, %59, %cst_31 {dimension_numbers = #tpu.dot_dimension_numbers<[1], [0], [0], [1], [0, 0, 1, 1], [], []>} : vector<64x32xf32>, vector<32x32xf32>, vector<64x32xf32> -> vector<64x32xf32>
    %c0_32 = arith.constant 0 : index
    %c0_33 = arith.constant 0 : index
    %61 = vector.load %arg13[%c0_32, %c0_33] : memref<1x32xf32, #tpu.memory_space<vmem>>, vector<1x32xf32>
    %62 = vector.broadcast %61 : vector<1x32xf32> to vector<64x32xf32>
    %63 = arith.addf %60, %62 : vector<64x32xf32>
    %c0_34 = arith.constant 0 : index
    %64 = memref.load %arg1[%c0_34] : memref<2xf32, #tpu.memory_space<smem>>
    %cst_35 = arith.constant 0.000000e+00 : f32
    %65 = arith.maximumf %64, %cst_35 : f32
    %c1 = arith.constant 1 : index
    %66 = memref.load %arg1[%c1] : memref<2xf32, #tpu.memory_space<smem>>
    %cst_36 = arith.constant 0.000000e+00 : f32
    %67 = arith.maximumf %66, %cst_36 : f32
    %68 = arith.addf %65, %67 : f32
    %cst_37 = arith.constant 9.99999996E-13 : f32
    %69 = arith.addf %68, %cst_37 : f32
    %cst_38 = arith.constant 1.000000e+00 : f32
    %70 = arith.divf %cst_38, %69 : f32
    %71 = arith.mulf %65, %70 : f32
    %72 = vector.broadcast %71 : f32 to vector<64x32xf32>
    %73 = arith.mulf %72, %63 : vector<64x32xf32>
    %74 = arith.mulf %67, %70 : f32
    %75 = vector.broadcast %74 : f32 to vector<64x32xf32>
    %76 = arith.mulf %75, %1 : vector<64x32xf32>
    %77 = arith.addf %73, %76 : vector<64x32xf32>
    %c0_39 = arith.constant 0 : index
    %c0_40 = arith.constant 0 : index
    %78 = vector.load %arg14[%c0_39, %c0_40] : memref<1x32xf32, #tpu.memory_space<vmem>>, vector<1x32xf32>
    %c0_41 = arith.constant 0 : index
    %c0_42 = arith.constant 0 : index
    %79 = vector.load %arg15[%c0_41, %c0_42] : memref<1x32xf32, #tpu.memory_space<vmem>>, vector<1x32xf32>
    %cst_43 = arith.constant dense<0.000000e+00> : vector<64xf32>
    %80 = vector.multi_reduction <add>, %77, %cst_43 [1] : vector<64x32xf32> to vector<64xf32>
    %81 = vector.shape_cast %80 : vector<64xf32> to vector<64x1xf32>
    %cst_44 = arith.constant 3.200000e+01 : f32
    %82 = vector.broadcast %cst_44 : f32 to vector<64x1xf32>
    %83 = arith.divf %81, %82 : vector<64x1xf32>
    %84 = vector.broadcast %83 : vector<64x1xf32> to vector<64x32xf32>
    %85 = arith.subf %77, %84 : vector<64x32xf32>
    %86 = arith.mulf %85, %85 : vector<64x32xf32>
    %cst_45 = arith.constant dense<0.000000e+00> : vector<64xf32>
    %87 = vector.multi_reduction <add>, %86, %cst_45 [1] : vector<64x32xf32> to vector<64xf32>
    %88 = vector.shape_cast %87 : vector<64xf32> to vector<64x1xf32>
    %cst_46 = arith.constant 3.200000e+01 : f32
    %89 = vector.broadcast %cst_46 : f32 to vector<64x1xf32>
    %90 = arith.divf %88, %89 : vector<64x1xf32>
    %cst_47 = arith.constant 9.99999974E-6 : f32
    %91 = vector.broadcast %cst_47 : f32 to vector<64x1xf32>
    %92 = arith.addf %90, %91 : vector<64x1xf32>
    %93 = math.rsqrt %92 : vector<64x1xf32>
    %94 = vector.broadcast %93 : vector<64x1xf32> to vector<64x32xf32>
    %95 = arith.mulf %85, %94 : vector<64x32xf32>
    %96 = vector.broadcast %78 : vector<1x32xf32> to vector<64x32xf32>
    %97 = arith.mulf %95, %96 : vector<64x32xf32>
    %98 = vector.broadcast %79 : vector<1x32xf32> to vector<64x32xf32>
    %99 = arith.addf %97, %98 : vector<64x32xf32>
    %c0_48 = arith.constant 0 : index
    %c0_49 = arith.constant 0 : index
    %100 = vector.load %arg16[%c0_48, %c0_49] : memref<32x64xf32, #tpu.memory_space<vmem>>, vector<32x64xf32>
    %cst_50 = arith.constant dense<0.000000e+00> : vector<64x64xf32>
    %101 = tpu.matmul %99, %100, %cst_50 {dimension_numbers = #tpu.dot_dimension_numbers<[1], [0], [0], [1], [0, 0, 1, 1], [], []>} : vector<64x32xf32>, vector<32x64xf32>, vector<64x64xf32> -> vector<64x64xf32>
    %c0_51 = arith.constant 0 : index
    %c0_52 = arith.constant 0 : index
    %102 = vector.load %arg17[%c0_51, %c0_52] : memref<1x64xf32, #tpu.memory_space<vmem>>, vector<1x64xf32>
    %103 = vector.broadcast %102 : vector<1x64xf32> to vector<64x64xf32>
    %104 = arith.addf %101, %103 : vector<64x64xf32>
    %cst_53 = arith.constant 5.000000e-01 : f32
    %105 = vector.broadcast %cst_53 : f32 to vector<64x64xf32>
    %106 = arith.mulf %105, %104 : vector<64x64xf32>
    %cst_54 = arith.constant 0.707106769 : f32
    %107 = vector.broadcast %cst_54 : f32 to vector<64x64xf32>
    %108 = arith.mulf %104, %107 : vector<64x64xf32>
    %109 = math.absf %108 : vector<64x64xf32>
    %cst_55 = arith.constant 0.327591091 : f32
    %110 = vector.broadcast %cst_55 : f32 to vector<64x64xf32>
    %111 = arith.mulf %110, %109 : vector<64x64xf32>
    %cst_56 = arith.constant 1.000000e+00 : f32
    %112 = vector.broadcast %cst_56 : f32 to vector<64x64xf32>
    %113 = arith.addf %112, %111 : vector<64x64xf32>
    %cst_57 = arith.constant 1.000000e+00 : f32
    %114 = vector.broadcast %cst_57 : f32 to vector<64x64xf32>
    %115 = arith.divf %114, %113 : vector<64x64xf32>
    %cst_58 = arith.constant 1.06140542 : f32
    %116 = vector.broadcast %cst_58 : f32 to vector<64x64xf32>
    %117 = arith.mulf %116, %115 : vector<64x64xf32>
    %cst_59 = arith.constant -1.45315206 : f32
    %118 = vector.broadcast %cst_59 : f32 to vector<64x64xf32>
    %119 = arith.addf %117, %118 : vector<64x64xf32>
    %120 = arith.mulf %119, %115 : vector<64x64xf32>
    %cst_60 = arith.constant 1.42141378 : f32
    %121 = vector.broadcast %cst_60 : f32 to vector<64x64xf32>
    %122 = arith.addf %120, %121 : vector<64x64xf32>
    %123 = arith.mulf %122, %115 : vector<64x64xf32>
    %cst_61 = arith.constant -0.284496725 : f32
    %124 = vector.broadcast %cst_61 : f32 to vector<64x64xf32>
    %125 = arith.addf %123, %124 : vector<64x64xf32>
    %126 = arith.mulf %125, %115 : vector<64x64xf32>
    %cst_62 = arith.constant 0.254829586 : f32
    %127 = vector.broadcast %cst_62 : f32 to vector<64x64xf32>
    %128 = arith.addf %126, %127 : vector<64x64xf32>
    %129 = arith.mulf %128, %115 : vector<64x64xf32>
    %cst_63 = arith.constant 0.000000e+00 : f32
    %130 = vector.broadcast %cst_63 : f32 to vector<64x64xf32>
    %131 = arith.subf %130, %109 : vector<64x64xf32>
    %132 = arith.mulf %131, %109 : vector<64x64xf32>
    %133 = math.exp %132 : vector<64x64xf32>
    %134 = arith.mulf %129, %133 : vector<64x64xf32>
    %cst_64 = arith.constant 1.000000e+00 : f32
    %135 = vector.broadcast %cst_64 : f32 to vector<64x64xf32>
    %136 = arith.subf %135, %134 : vector<64x64xf32>
    %cst_65 = arith.constant 0.000000e+00 : f32
    %137 = vector.broadcast %cst_65 : f32 to vector<64x64xf32>
    %138 = arith.cmpf oge, %108, %137 : vector<64x64xf32>
    %cst_66 = arith.constant 0.000000e+00 : f32
    %139 = vector.broadcast %cst_66 : f32 to vector<64x64xf32>
    %140 = arith.subf %139, %136 : vector<64x64xf32>
    %141 = arith.select %138, %136, %140 : vector<64x64xi1>, vector<64x64xf32>
    %cst_67 = arith.constant 1.000000e+00 : f32
    %142 = vector.broadcast %cst_67 : f32 to vector<64x64xf32>
    %143 = arith.addf %142, %141 : vector<64x64xf32>
    %144 = arith.mulf %106, %143 : vector<64x64xf32>
    %c0_68 = arith.constant 0 : index
    %c0_69 = arith.constant 0 : index
    %145 = vector.load %arg18[%c0_68, %c0_69] : memref<64x32xf32, #tpu.memory_space<vmem>>, vector<64x32xf32>
    %cst_70 = arith.constant dense<0.000000e+00> : vector<64x32xf32>
    %146 = tpu.matmul %144, %145, %cst_70 {dimension_numbers = #tpu.dot_dimension_numbers<[1], [0], [0], [1], [0, 0, 1, 1], [], []>} : vector<64x64xf32>, vector<64x32xf32>, vector<64x32xf32> -> vector<64x32xf32>
    %c0_71 = arith.constant 0 : index
    %c0_72 = arith.constant 0 : index
    %147 = vector.load %arg19[%c0_71, %c0_72] : memref<1x32xf32, #tpu.memory_space<vmem>>, vector<1x32xf32>
    %148 = vector.broadcast %147 : vector<1x32xf32> to vector<64x32xf32>
    %149 = arith.addf %146, %148 : vector<64x32xf32>
    %c0_73 = arith.constant 0 : index
    %150 = memref.load %arg2[%c0_73] : memref<2xf32, #tpu.memory_space<smem>>
    %cst_74 = arith.constant 0.000000e+00 : f32
    %151 = arith.maximumf %150, %cst_74 : f32
    %c1_75 = arith.constant 1 : index
    %152 = memref.load %arg2[%c1_75] : memref<2xf32, #tpu.memory_space<smem>>
    %cst_76 = arith.constant 0.000000e+00 : f32
    %153 = arith.maximumf %152, %cst_76 : f32
    %154 = arith.addf %151, %153 : f32
    %cst_77 = arith.constant 9.99999996E-13 : f32
    %155 = arith.addf %154, %cst_77 : f32
    %cst_78 = arith.constant 1.000000e+00 : f32
    %156 = arith.divf %cst_78, %155 : f32
    %157 = arith.mulf %151, %156 : f32
    %158 = vector.broadcast %157 : f32 to vector<64x32xf32>
    %159 = arith.mulf %158, %149 : vector<64x32xf32>
    %160 = arith.mulf %153, %156 : f32
    %161 = vector.broadcast %160 : f32 to vector<64x32xf32>
    %162 = arith.mulf %161, %77 : vector<64x32xf32>
    %163 = arith.addf %159, %162 : vector<64x32xf32>
    %c0_79 = arith.constant 0 : index
    %c0_80 = arith.constant 0 : index
    %c0_81 = arith.constant 0 : index
    %164 = vector.load %arg20[%c0_79, %c0_80, %c0_81] : memref<1x64x32xf32, #tpu.memory_space<vmem>>, vector<1x64x32xf32>
    %165 = vector.shape_cast %164 : vector<1x64x32xf32> to vector<64x32xf32>
    %166 = vector.shape_cast %163 : vector<64x32xf32> to vector<1x64x32xf32>
    tpu.vector_store %arg20[%c0_79, %c0_80, %c0_81], %166 {strides = array<i32>} : memref<1x64x32xf32, #tpu.memory_space<vmem>>, vector<1x64x32xf32>,
    return
  }
  func.func @transform_0(%arg0: i32) -> i32 {
    %c0_i32 = arith.constant 0 : i32
    %c0_i32_0 = arith.constant 0 : i32
    return %c0_i32 : i32
  }
  func.func @transform_1(%arg0: i32) -> i32 {
    %c0_i32 = arith.constant 0 : i32
    %c0_i32_0 = arith.constant 0 : i32
    return %c0_i32 : i32
  }
  func.func @transform_2(%arg0: i32) -> (i32, i32, i32) {
    %c0_i32 = arith.constant 0 : i32
    %c0_i32_0 = arith.constant 0 : i32
    %c0_i32_1 = arith.constant 0 : i32
    return %arg0, %c0_i32, %c0_i32_0 : i32, i32, i32
  }
  func.func @transform_3(%arg0: i32) -> (i32, i32) {
    %c0_i32 = arith.constant 0 : i32
    %c0_i32_0 = arith.constant 0 : i32
    %c0_i32_1 = arith.constant 0 : i32
    return %c0_i32, %c0_i32_0 : i32, i32
  }
  func.func @transform_4(%arg0: i32) -> (i32, i32) {
    %c0_i32 = arith.constant 0 : i32
    %c0_i32_0 = arith.constant 0 : i32
    %c0_i32_1 = arith.constant 0 : i32
    return %c0_i32, %c0_i32_0 : i32, i32
  }
  func.func @transform_5(%arg0: i32) -> (i32, i32) {
    %c0_i32 = arith.constant 0 : i32
    %c0_i32_0 = arith.constant 0 : i32
    %c0_i32_1 = arith.constant 0 : i32
    return %c0_i32, %c0_i32_0 : i32, i32
  }
  func.func @transform_6(%arg0: i32) -> (i32, i32) {
    %c0_i32 = arith.constant 0 : i32
    %c0_i32_0 = arith.constant 0 : i32
    %c0_i32_1 = arith.constant 0 : i32
    return %c0_i32, %c0_i32_0 : i32, i32
  }
  func.func @transform_7(%arg0: i32) -> (i32, i32) {
    %c0_i32 = arith.constant 0 : i32
    %c0_i32_0 = arith.constant 0 : i32
    %c0_i32_1 = arith.constant 0 : i32
    return %c0_i32, %c0_i32_0 : i32, i32
  }
  func.func @transform_8(%arg0: i32) -> (i32, i32) {
    %c0_i32 = arith.constant 0 : i32
    %c0_i32_0 = arith.constant 0 : i32
    %c0_i32_1 = arith.constant 0 : i32
    return %c0_i32, %c0_i32_0 : i32, i32
  }
  func.func @transform_9(%arg0: i32) -> (i32, i32) {
    %c0_i32 = arith.constant 0 : i32
    %c0_i32_0 = arith.constant 0 : i32
    %c0_i32_1 = arith.constant 0 : i32
    return %c0_i32, %c0_i32_0 : i32, i32
  }
  func.func @transform_10(%arg0: i32) -> (i32, i32) {
    %c0_i32 = arith.constant 0 : i32
    %c0_i32_0 = arith.constant 0 : i32
    %c0_i32_1 = arith.constant 0 : i32
    return %c0_i32, %c0_i32_0 : i32, i32
  }
  func.func @transform_11(%arg0: i32) -> (i32, i32) {
    %c0_i32 = arith.constant 0 : i32
    %c0_i32_0 = arith.constant 0 : i32
    %c0_i32_1 = arith.constant 0 : i32
    return %c0_i32, %c0_i32_0 : i32, i32
  }
  func.func @transform_12(%arg0: i32) -> (i32, i32) {
    %c0_i32 = arith.constant 0 : i32
    %c0_i32_0 = arith.constant 0 : i32
    %c0_i32_1 = arith.constant 0 : i32
    return %c0_i32, %c0_i32_0 : i32, i32
  }
  func.func @transform_13(%arg0: i32) -> (i32, i32) {
    %c0_i32 = arith.constant 0 : i32
    %c0_i32_0 = arith.constant 0 : i32
    %c0_i32_1 = arith.constant 0 : i32
    return %c0_i32, %c0_i32_0 : i32, i32
  }
  func.func @transform_14(%arg0: i32) -> (i32, i32) {
    %c0_i32 = arith.constant 0 : i32
    %c0_i32_0 = arith.constant 0 : i32
    %c0_i32_1 = arith.constant 0 : i32
    return %c0_i32, %c0_i32_0 : i32, i32
  }
  func.func @transform_15(%arg0: i32) -> (i32, i32) {
    %c0_i32 = arith.constant 0 : i32
    %c0_i32_0 = arith.constant 0 : i32
    %c0_i32_1 = arith.constant 0 : i32
    return %c0_i32, %c0_i32_0 : i32, i32
  }
  func.func @transform_16(%arg0: i32) -> (i32, i32) {
    %c0_i32 = arith.constant 0 : i32
    %c0_i32_0 = arith.constant 0 : i32
    %c0_i32_1 = arith.constant 0 : i32
    return %c0_i32, %c0_i32_0 : i32, i32
  }
  func.func @transform_17(%arg0: i32) -> (i32, i32) {
    %c0_i32 = arith.constant 0 : i32
    %c0_i32_0 = arith.constant 0 : i32
    %c0_i32_1 = arith.constant 0 : i32
    return %c0_i32, %c0_i32_0 : i32, i32
  }
  func.func @transform_18(%arg0: i32) -> (i32, i32) {
    %c0_i32 = arith.constant 0 : i32
    %c0_i32_0 = arith.constant 0 : i32
    %c0_i32_1 = arith.constant 0 : i32
    return %c0_i32, %c0_i32_0 : i32, i32
  }
  func.func @transform_19(%arg0: i32) -> (i32, i32, i32) {
    %c0_i32 = arith.constant 0 : i32
    %c0_i32_0 = arith.constant 0 : i32
    %c0_i32_1 = arith.constant 0 : i32
    return %arg0, %c0_i32, %c0_i32_0 : i32, i32, i32
  }
}

</mosaic_0001>

<bundles_post_ra>
// kernel: tpu_custom_call.1
= control target key start
LH: loop header
LB: loop body
LE: loop exit
PB: predicated region body
PF: predicated region fallthrough
CT: control target
= control target key end

     0   :  { %s3291_s0 = inlined_call_operand.vmem [shape: f32[2], index: 0, kind: input, shape index: {}]   ;;  %s3292_s1 = inlined_call_operand.vmem [shape: f32[2], index: 1, kind: input, shape index: {}]   ;;  %s3293_s2 = inlined_call_operand.vmem [shape: f32[2,64,32], index: 2, kind: input, shape index: {}]   ;;  %s3294_s3 = inlined_call_operand.vmem [shape: f32[1,32], index: 3, kind: input, shape index: {}]   ;;  %s3295_s4 = inlined_call_operand.vmem [shape: f32[1,32], index: 4, kind: input, shape index: {}]   ;;  %s3296_s5 = inlined_call_operand.vmem [shape: f32[1,32], index: 5, kind: input, shape index: {}]   ;;  %s3297_s6 = inlined_call_operand.<no memory space> [shape: f32[1,1], index: 6, kind: input, shape index: {}]   ;;  %s3298_s7 = inlined_call_operand.vmem [shape: f32[32,32], index: 7, kind: input, shape index: {}]   ;;  %s3299_s8 = inlined_call_operand.vmem [shape: f32[1,32], index: 8, kind: input, shape index: {}]   ;;  %s3300_s9 = inlined_call_operand.vmem [shape: f32[32,32], index: 9, kind: input, shape index: {}]   ;;  %s3301_s10 = inlined_call_operand.vmem [shape: f32[1,32], index: 10, kind: input, shape index: {}]   ;;  %s3302_s11 = inlined_call_operand.vmem [shape: f32[32,32], index: 11, kind: input, shape index: {}]   ;;  %s3303_s12 = inlined_call_operand.vmem [shape: f32[1,32], index: 12, kind: input, shape index: {}]   ;;  %s3304_s13 = inlined_call_operand.vmem [shape: f32[1,32], index: 13, kind: input, shape index: {}]   ;;  %s3305_s14 = inlined_call_operand.vmem [shape: f32[1,32], index: 14, kind: input, shape index: {}]   ;;  %s3306_s15 = inlined_call_operand.vmem [shape: f32[32,64], index: 15, kind: input, shape index: {}]   ;;  %s3307_s16 = inlined_call_operand.vmem [shape: f32[1,64], index: 16, kind: input, shape index: {}]   ;;  %s3308_s17 = inlined_call_operand.vmem [shape: f32[64,32], index: 17, kind: input, shape index: {}]   ;;  %s3309_s18 = inlined_call_operand.vmem [shape: f32[1,32], index: 18, kind: input, shape index: {}]   ;;  %s3310_s19 = inlined_call_operand.vmem [shape: f32[2,64,32], index: 19, kind: output, shape index: {}]  }
   0x1   :  { %3311 = sst [smem:[#allocation9_spill]] %s3291_s0  ;;  %v24_v0 = vstv %s3297_s6 }
   0x2   :  { %3312 = sst [smem:[#allocation10_spill]] %s3292_s1  ;;  %25 = vst [vmem:[#allocation2] sm:$0x1] %v24_v0 }
   0x3   :  { %3313 = sst [smem:[#allocation11_spill]] %s3293_s2 }
   0x4   :  { %3314 = sst [smem:[#allocation12_spill]] %s3294_s3 }
   0x5   :  { %26 = vsyncpa [#allocation4], 0 }
   0x6   :  { %27 = vsyncpa [#allocation6], 0  ;;  %s2492_s20 = smov 0  }
   0x7 LB: > { %s2121_s21 = sadd.s32 4294967295, %s2382_s20   ;;  %p2123_p0 = scmp.ge.s32.totalorder %s2382_s20, 1  ;;  %s2382_s20 = sphi %s2492_s20, %s33_s20  }
   0x8   : > { %p468_p1 = scmp.lt.s32.totalorder %s2382_s20, 3  ;;  %s3315_s2 = sld [smem:[#allocation9_spill]] }
   0x9   : > { %p2211_p3 = scmp.eq.s32.totalorder %s2121_s21, 0  ;;  %s3316_s25 = sld [smem:[#allocation10_spill]] }
   0xa   : > { %p469_p2 = pnand %p2123_p0, %p468_p1  ;;  %s2384_s26 = smov [#allocation3]  }
   0xb   : > { %s2385_s27 = smov [#allocation5]  }
   0xc   : > { %p2204_p4 = pneg %p469_p2 }
   0xd   : > { %559 = sbr.rel (%p469_p2) target bundleno = 1533 (0x5fd), region = 96 }
   0xe   : > { %s480_s6 = sshll.u32 %s3315_s2, 4  ;;  %p2205_p5 = pnand %p2211_p3, %p2204_p4  ;;  %s481_s6 = int_to_ptr.vmem [resolvable:$true] %s480_s6 }
   0xf   : > { %s490_s3 = sshll.u32 %s3316_s25, 4  ;;  %s491_s3 = int_to_ptr.vmem [resolvable:$true] %s490_s3 }
  0x10   : > { %2207 = dma.vmem_to_smem (!%p2205_p5), %s481_s6, 16, %s2384_s26, [#allocation4]  }
  0x11   : > { %2210 = dma.vmem_to_smem (!%p2205_p5), %s491_s3, 16, %s2385_s27, [#allocation6]  }
  0x12   : > { %2373 = dma.done.wait (%p2211_p3), [#allocation4], 16  }
  0x13   : > { %2375 = vsyncadd (%p2211_p3), [#allocation4], 4294967280 }
  0x14   : > { %2377 = dma.done.wait (%p2211_p3), [#allocation6], 16  }
  0x15   : > { %2379 = vsyncadd (%p2211_p3), [#allocation6], 4294967280 }
  0x16   : > { %571 = sfence }
  0x17   : > { %p622_p6 = scmp.lt.s32.totalorder %s2121_s21, 1  ;;  %vm642_vm0 = vcmask 261120   ;;  %s3317_s30 = sld [smem:[#allocation11_spill]]  ;;  %v2386_v17 = vmov 32.0   ;;  %v988_v0 = vld [vmem:[%s3298_s7 + $0x18] sm:$0xff] }
  0x18   : > { %2242 = vrcp.f32 %v2386_v17  ;;  %1029 = vmatpush.msra.mxu0 %v988_v0  ;;  %2180 = vmatpush.msra.mxu1 %v988_v0  ;;  %s3320_s3 = sld [smem:[#allocation12_spill]]  ;;  %s2388_s23 = smov 0.0  }
  0x19   : > { %s3334_s21 = smov (!%p622_p6, %s2121_s21), 1  ;;  %2181 = vmatpush.msra.mxu2 %v988_v0  ;;  %2182 = vmatpush.msra.mxu3 %v988_v0  ;;  %s2158_s22 = sld [smem:[#allocation3 + $0x1]] }
  0x1a   : > { %s2178_s28 = sshll.u32 %s3334_s21, 6  ;;  %s1986_s2 = sld [smem:[#allocation5]] }
  0x1b   : > { %s2175_s6 = sld [smem:[#allocation5 + $0x1]] }
  0x1d   : > { %s2519_s1 = scalar_lea.vmem %s3317_s30, %s2178_s28  ;;  %s1265_s30 = sld [smem:[#allocation3]] }
  0x1e   : > { %v636_v1 = vld [vmem:[%s2519_s1 + $0x20] sm:$0xff]  ;;  %v634_v2 = vld [vmem:[%s2519_s1 + $0x10] sm:$0xff]  ;;  %v637_v7 = vld [vmem:[%s2519_s1 + $0x28] sm:$0xff]  ;;  %v2243_v18 = vpop.eup %2242 }
  0x1f   : > { %v632_v3 = vld [vmem:[%s2519_s1] sm:$0xff]  ;;  %v655_v4 = vsel %vm642_vm0, %v636_v1, 0.0  ;;  %v649_v5 = vsel %vm642_vm0, %v634_v2, 0.0  ;;  %v635_v8 = vld [vmem:[%s2519_s1 + $0x18] sm:$0xff]  ;;  %v633_v9 = vld [vmem:[%s2519_s1 + $0x8] sm:$0xff]  ;;  %v658_v10 = vsel %vm642_vm0, %v637_v7, 0.0  ;;  %vm672_vm1 = vweird.f32 %v2243_v18  ;;  %s2812_s25 = smax.f32 %s2388_s23, %s2158_s22 }
  0x20   : > { %v643_v6 = vsel %vm642_vm0, %v632_v3, 0.0  ;;  %656 = vadd.xlane.f32.xlu2 %v655_v4  ;;  %650 = vadd.xlane.f32.xlu1 %v649_v5  ;;  %v652_v11 = vsel %vm642_vm0, %v635_v8, 0.0  ;;  %v646_v12 = vsel %vm642_vm0, %v633_v9, 0.0  ;;  %v639_v13 = vld [vmem:[%s2519_s1 + $0x38] sm:$0xff]  ;;  %v638_v14 = vld [vmem:[%s2519_s1 + $0x30] sm:$0xff]  ;;  %v668_v19 = vmul.f32 32.0, %v2243_v18 }
  0x21   : > { %644 = vadd.xlane.f32.xlu0 %v643_v6  ;;  %v664_v15 = vsel %vm642_vm0, %v639_v13, 0.0  ;;  %v661_v16 = vsel %vm642_vm0, %v638_v14, 0.0  ;;  %s2816_s26 = smax.f32 %s2388_s23, %s2175_s6 }
  0x22   : > { %v669_v20 = vsub.f32 1.0, %v668_v19  ;;  %v1060_v19 = vld [vmem:[%s3300_s9 + $0x10] sm:$0xff] }
  0x23   : > { %s2810_s24 = smax.f32 %s2388_s23, %s1265_s30 }
  0x24   : > { %v670_v21 = vmul.f32 %v2243_v18, %v669_v20  ;;  %s1269_s27 = sadd.f32 %s2812_s25, %s2810_s24 }
  0x26   : > { %v671_v22 = vadd.f32 %v2243_v18, %v670_v21  ;;  %s1270_s0 = sadd.f32 1e-12, %s1269_s27 }
  0x28   : > { %659 = vadd.xlane.f32.xlu2 %v658_v10  ;;  %653 = vadd.xlane.f32.xlu1 %v652_v11  ;;  %v2537_v23 = vsel %vm672_vm1, %v2243_v18, %v671_v22 }
  0x29   : > { %647 = vadd.xlane.f32.xlu0 %v646_v12 }
  0x30   : > { %665 = vadd.xlane.f32.xlu1 %v664_v15 }
  0x31   : > { %662 = vadd.xlane.f32.xlu0 %v661_v16 }
  0x93   : > { %v657_v24 = vpop.xlane.xlu2 %656  ;;  %v651_v25 = vpop.xlane.xlu1 %650 }
  0x94   : > { %v676_v26 = vmul.f32 %v2537_v23, %v651_v25  ;;  %v645_v27 = vpop.xlane.xlu0 %644  ;;  %v678_v40 = vmul.f32 %v2537_v23, %v657_v24 }
  0x95   : > { %v674_v28 = vmul.f32 %v2537_v23, %v645_v27 }
  0x96   : > { %v2541_v29 = vsub.f32 %v634_v2, %v676_v26  ;;  %v2565_v47 = vsub.f32 %v636_v1, %v678_v40  ;;  %v987_v1 = vld [vmem:[%s3298_s7 + $0x10] sm:$0xff]  ;;  %v986_v2 = vld [vmem:[%s3298_s7 + $0x8] sm:$0xff] }
  0x97   : > { %v2543_v30 = vsub.f32 %v632_v3, %v674_v28  ;;  %1030 = vmatpush.msra.mxu0 %v987_v1  ;;  %2183 = vmatpush.msra.mxu1 %v987_v1  ;;  %v985_v3 = vld [vmem:[%s3298_s7] sm:$0xff]  ;;  %v1059_v26 = vld [vmem:[%s3300_s9 + $0x8] sm:$0xff] }
  0x98   : > { %v692_v31 = vmul.f32 %v2541_v29, %v2541_v29  ;;  %v694_v56 = vmul.f32 %v2565_v47, %v2565_v47  ;;  %2184 = vmatpush.msra.mxu2 %v987_v1  ;;  %2185 = vmatpush.msra.mxu3 %v987_v1 }
  0x99   : > { %v690_v32 = vmul.f32 %v2543_v30, %v2543_v30  ;;  %1031 = vmatpush.msra.mxu0 %v986_v2  ;;  %2186 = vmatpush.msra.mxu1 %v986_v2 }
  0x9a   : > { %v704_v33 = vsel %vm642_vm0, %v692_v31, 0.0  ;;  %v710_v59 = vsel %vm642_vm0, %v694_v56, 0.0  ;;  %2187 = vmatpush.msra.mxu2 %v986_v2  ;;  %2188 = vmatpush.msra.mxu3 %v986_v2  ;;  %v1058_v31 = vld [vmem:[%s3300_s9] sm:$0xff] }
  0x9b   : > { %v660_v34 = vpop.xlane.xlu2 %659  ;;  %705 = vadd.xlane.f32.xlu1 %v704_v33  ;;  %v654_v35 = vpop.xlane.xlu1 %653  ;;  %v698_v36 = vsel %vm642_vm0, %v690_v32, 0.0  ;;  %1032 = vmatpush.msra.mxu0 %v985_v3 }
  0x9c   : > { %v679_v37 = vmul.f32 %v2537_v23, %v660_v34  ;;  %v677_v38 = vmul.f32 %v2537_v23, %v654_v35  ;;  %699 = vadd.xlane.f32.xlu2 %v698_v36  ;;  %v648_v39 = vpop.xlane.xlu0 %647  ;;  %2189 = vmatpush.msra.mxu1 %v985_v3 }
  0x9d   : > { %v675_v41 = vmul.f32 %v2537_v23, %v648_v39  ;;  %2190 = vmatpush.msra.mxu2 %v985_v3  ;;  %2191 = vmatpush.msra.mxu3 %v985_v3  ;;  %v2652_v3 = vld [vmem:[%s3295_s4] ss:$0 sm:$0xff] }
  0x9e   : > { %v2555_v42 = vsub.f32 %v637_v7, %v679_v37  ;;  %v2557_v43 = vsub.f32 %v635_v8, %v677_v38 }
  0x9f   : > { %v2559_v44 = vsub.f32 %v633_v9, %v675_v41 }
  0xa0   : > { %v695_v45 = vmul.f32 %v2555_v42, %v2555_v42  ;;  %v693_v46 = vmul.f32 %v2557_v43, %v2557_v43 }
  0xa1   : > { %v691_v48 = vmul.f32 %v2559_v44, %v2559_v44 }
  0xa2   : > { %v713_v49 = vsel %vm642_vm0, %v695_v45, 0.0  ;;  %v707_v50 = vsel %vm642_vm0, %v693_v46, 0.0 }
  0xa3   : > { %714 = vadd.xlane.f32.xlu1 %v713_v49  ;;  %v701_v51 = vsel %vm642_vm0, %v691_v48, 0.0  ;;  %v666_v52 = vpop.xlane.xlu1 %665 }
  0xa4   : > { %708 = vadd.xlane.f32.xlu2 %v707_v50  ;;  %702 = vadd.xlane.f32.xlu0 %v701_v51  ;;  %v663_v53 = vpop.xlane.xlu0 %662  ;;  %v681_v55 = vmul.f32 %v2537_v23, %v666_v52 }
  0xa5   : > { %v680_v54 = vmul.f32 %v2537_v23, %v663_v53 }
  0xa6   : > { %v2578_v58 = vsub.f32 %v639_v13, %v681_v55 }
  0xa7   : > { %v2576_v57 = vsub.f32 %v638_v14, %v680_v54  ;;  %v1061_v14 = vld [vmem:[%s3300_s9 + $0x18] sm:$0xff] }
  0xa8   : > { %v697_v62 = vmul.f32 %v2578_v58, %v2578_v58  ;;  %1078 = vmatpush.msrb.mxu1 %v1061_v14 }
  0xa9   : > { %v696_v60 = vmul.f32 %v2576_v57, %v2576_v57 }
  0xaa   : > { %v719_v63 = vsel %vm642_vm0, %v697_v62, 0.0  ;;  %1079 = vmatpush.msrb.mxu1 %v1060_v19 }
  0xab   : > { %v716_v61 = vsel %vm642_vm0, %v696_v60, 0.0 }
  0xac   : > { %711 = vadd.xlane.f32.xlu0 %v710_v59  ;;  %717 = vadd.xlane.f32.xlu2 %v716_v61  ;;  %v2645_v61 = vld [vmem:[%s3320_s3] ss:$0 sm:$0xff]  ;;  %s2814_s3 = smax.f32 %s2388_s23, %s1986_s2 }
  0xad   : > { %1080 = vmatpush.msrb.mxu1 %v1059_v26  ;;  %s1990_s29 = sadd.f32 %s2816_s26, %s2814_s3 }
  0xaf   : > { %1081 = vmatpush.msrb.mxu1 %v1058_v31  ;;  %s1991_s30 = sadd.f32 1e-12, %s1990_s29 }
  0xb4   : > { %720 = vadd.xlane.f32.xlu0 %v719_v63 }
 0x10e   : > { %v706_v4 = vpop.xlane.xlu1 %705 }
 0x10f   : > { %v724_v5 = vmul.f32 %v706_v4, %v2537_v23  ;;  %v700_v6 = vpop.xlane.xlu2 %699 }
 0x110   : > { %v722_v7 = vmul.f32 %v700_v6, %v2537_v23 }
 0x111   : > { %v732_v8 = vadd.f32 1e-05, %v724_v5 }
 0x112   : > { %v730_v9 = vadd.f32 1e-05, %v722_v7 }
 0x113   : > { %2244 = vrsqrt.f32 %v732_v8  ;;  %vm764_vm2 = vweird.f32 %v732_v8 }
 0x114   : > { %2246 = vrsqrt.f32 %v730_v9  ;;  %vm744_vm6 = vweird.f32 %v730_v9 }
 0x116   : > { %v715_v10 = vpop.xlane.xlu1 %714 }
 0x117   : > { %v727_v11 = vmul.f32 %v715_v10, %v2537_v23  ;;  %v709_v12 = vpop.xlane.xlu2 %708  ;;  %v703_v13 = vpop.xlane.xlu0 %702 }
 0x118   : > { %v725_v15 = vmul.f32 %v709_v12, %v2537_v23  ;;  %v723_v16 = vmul.f32 %v703_v13, %v2537_v23 }
 0x119   : > { %v2245_v17 = vpop.eup %2244  ;;  %v735_v18 = vadd.f32 1e-05, %v727_v11 }
 0x11a   : > { %v2247_v20 = vpop.eup %2246  ;;  %v759_v21 = vmul.f32 %v2245_v17, %v732_v8  ;;  %v2610_v22 = vadd.f32 1e-05, %v725_v15  ;;  %v2612_v24 = vadd.f32 1e-05, %v723_v16  ;;  %vm765_vm3 = vweird.f32 %v2245_v17 }
 0x11b   : > { %v739_v25 = vmul.f32 %v2247_v20, %v730_v9  ;;  %2248 = vrsqrt.f32 %v735_v18  ;;  %vm745_vm4 = vweird.f32 %v2247_v20  ;;  %vm2629_vm5 = vmor %vm764_vm2, %vm765_vm3  ;;  %vm794_vm8 = vweird.f32 %v735_v18 }
 0x11c   : > { %v760_v27 = vmul.f32 %v2245_v17, %v759_v21  ;;  %2250 = vrsqrt.f32 %v2610_v22  ;;  %vm746_vm7 = vmor %vm744_vm6, %vm745_vm4  ;;  %vm774_vm10 = vweird.f32 %v2610_v22  ;;  %vm754_vm15 = vweird.f32 %v2612_v24 }
 0x11d   : > { %v740_v28 = vmul.f32 %v2247_v20, %v739_v25  ;;  %2252 = vrsqrt.f32 %v2612_v24 }
 0x11e   : > { %v761_v32 = vmul.f32 0.5, %v760_v27 }
 0x11f   : > { %v741_v33 = vmul.f32 0.5, %v740_v28  ;;  %v718_v34 = vpop.xlane.xlu2 %717  ;;  %v712_v35 = vpop.xlane.xlu0 %711 }
 0x120   : > { %v762_v36 = vsub.f32 1.5, %v761_v32  ;;  %v728_v37 = vmul.f32 %v718_v34, %v2537_v23  ;;  %v726_v38 = vmul.f32 %v712_v35, %v2537_v23 }
 0x121   : > { %v2249_v39 = vpop.eup %2248  ;;  %v742_v40 = vsub.f32 1.5, %v741_v33 }
 0x122   : > { %v2624_v41 = vpop.eup %2250  ;;  %v763_v45 = vmul.f32 %v2245_v17, %v762_v36  ;;  %v789_v46 = vmul.f32 %v2249_v39, %v735_v18  ;;  %v2626_v48 = vadd.f32 1e-05, %v728_v37  ;;  %v2635_v53 = vadd.f32 1e-05, %v726_v38 }
 0x123   : > { %v2253_v49 = vpop.eup %2252  ;;  %v743_v51 = vmul.f32 %v2247_v20, %v742_v40  ;;  %v769_v52 = vmul.f32 %v2624_v41, %v2610_v22  ;;  %vm795_vm9 = vweird.f32 %v2249_v39  ;;  %vm775_vm12 = vweird.f32 %v2624_v41 }
 0x124   : > { %v767_v54 = vsel %vm2629_vm5, %v2245_v17, %v763_v45  ;;  %v790_v55 = vmul.f32 %v2249_v39, %v789_v46  ;;  %v749_v56 = vmul.f32 %v2253_v49, %v2612_v24  ;;  %2254 = vrsqrt.f32 %v2626_v48  ;;  %vm2658_vm11 = vmor %vm794_vm8, %vm795_vm9  ;;  %v2677_v17 = vld [vmem:[%s3296_s5] ss:$0 sm:$0xff] }
 0x125   : > { %v747_v59 = vsel %vm746_vm7, %v2247_v20, %v743_v51  ;;  %v770_v60 = vmul.f32 %v2624_v41, %v769_v52  ;;  %2256 = vrsqrt.f32 %v2635_v53  ;;  %v820_v4 = vmul.f32 %v767_v54, %v2541_v29  ;;  %vm2683_vm14 = vmor %vm774_vm10, %vm775_vm12 }
 0x126   : > { %v791_v62 = vmul.f32 0.5, %v790_v55  ;;  %v750_v63 = vmul.f32 %v2253_v49, %v749_v56  ;;  %v818_v2 = vmul.f32 %v747_v59, %v2543_v30  ;;  %vm755_vm13 = vweird.f32 %v2253_v49 }
 0x127   : > { %v771_v0 = vmul.f32 0.5, %v770_v60  ;;  %v721_v1 = vpop.xlane.xlu0 %720  ;;  %v831_v10 = vmul.f32 %v2645_v61, %v820_v4  ;;  %vm756_vm1 = vmor %vm754_vm15, %vm755_vm13  ;;  %vm804_vm2 = vweird.f32 %v2626_v48  ;;  %vm784_vm6 = vweird.f32 %v2635_v53 }
 0x128   : > { %v792_v5 = vsub.f32 1.5, %v791_v62  ;;  %v751_v6 = vmul.f32 0.5, %v750_v63  ;;  %v729_v7 = vmul.f32 %v721_v1, %v2537_v23  ;;  %v829_v30 = vmul.f32 %v2645_v61, %v818_v2 }
 0x129   : > { %v772_v9 = vsub.f32 1.5, %v771_v0  ;;  %v2672_v16 = vadd.f32 %v2652_v3, %v831_v10 }
 0x12a   : > { %v793_v11 = vmul.f32 %v2249_v39, %v792_v5  ;;  %v752_v29 = vsub.f32 1.5, %v751_v6  ;;  %v2665_v12 = vadd.f32 1e-05, %v729_v7  ;;  %v2255_v13 = vpop.eup %2254  ;;  %v2669_v15 = vadd.f32 %v2652_v3, %v829_v30 }
 0x12b   : > { %v773_v14 = vmul.f32 %v2624_v41, %v772_v9  ;;  %v2257_v18 = vpop.eup %2256  ;;  %v799_v25 = vmul.f32 %v2255_v13, %v2626_v48  ;;  %2136 = vmatmul.msk.f32.vlgmr.msra.gmra.mxu1 %vm642_vm0, %v2672_v16  ;;  %v854_v32 = vmul.f32 %v2677_v17, %v2672_v16  ;;  %vm805_vm3 = vweird.f32 %v2255_v13 }
 0x12c   : > { %v797_v19 = vsel %vm2658_vm11, %v2249_v39, %v793_v11  ;;  %v753_v21 = vmul.f32 %v2253_v49, %v752_v29  ;;  %v779_v28 = vmul.f32 %v2257_v18, %v2635_v53  ;;  %2134 = vmatmul.msk.f32.vlgmr.msra.gmra.mxu0 %vm642_vm0, %v2669_v15  ;;  %2258 = vrsqrt.f32 %v2665_v12  ;;  %vm806_vm5 = vmor %vm804_vm2, %vm805_vm3 }
 0x12d   : > { %v823_v26 = vmul.f32 %v797_v19, %v2555_v42  ;;  %v777_v27 = vsel %vm2683_vm14, %v2624_v41, %v773_v14  ;;  %v800_v24 = vmul.f32 %v2255_v13, %v799_v25  ;;  %v852_v42 = vmul.f32 %v2677_v17, %v2669_v15  ;;  %v2234_v19 = vld [vmem:[#allocation2] ss:$0 sm:$0xff] }
 0x12e   : > { %v757_v22 = vsel %vm756_vm1, %v2253_v49, %v753_v21  ;;  %v780_v31 = vmul.f32 %v2257_v18, %v779_v28  ;;  %v821_v35 = vmul.f32 %v777_v27, %v2557_v43  ;;  %v866_v39 = vsel %vm642_vm0, %v854_v32, 0.0 }
 0x12f   : > { %v819_v33 = vmul.f32 %v757_v22, %v2559_v44  ;;  %v801_v34 = vmul.f32 0.5, %v800_v24  ;;  %v834_v36 = vmul.f32 %v2645_v61, %v823_v26  ;;  %v860_v38 = vsel %vm642_vm0, %v852_v42, 0.0  ;;  %867 = vadd.xlane.f32.xlu0 %v866_v39 }
 0x130   : > { %v781_v37 = vmul.f32 0.5, %v780_v31  ;;  %861 = vadd.xlane.f32.xlu1 %v860_v38  ;;  %v832_v44 = vmul.f32 %v2645_v61, %v821_v35  ;;  %vm785_vm4 = vweird.f32 %v2257_v18  ;;  %vm814_vm9 = vweird.f32 %v2665_v12 }
 0x131   : > { %v830_v40 = vmul.f32 %v2645_v61, %v819_v33  ;;  %v802_v41 = vsub.f32 1.5, %v801_v34  ;;  %v845_v45 = vadd.f32 %v2652_v3, %v834_v36  ;;  %vm786_vm7 = vmor %vm784_vm6, %vm785_vm4  ;;  %vm896_vm11 = vcmask 7168  }
 0x132   : > { %v782_v46 = vsub.f32 1.5, %v781_v37  ;;  %v2259_v49 = vpop.eup %2258  ;;  %v843_v51 = vadd.f32 %v2652_v3, %v832_v44 }
 0x133   : > { %v841_v43 = vadd.f32 %v2652_v3, %v830_v40  ;;  %v803_v50 = vmul.f32 %v2255_v13, %v802_v41  ;;  %v857_v52 = vmul.f32 %v2677_v17, %v845_v45  ;;  %v809_v55 = vmul.f32 %v2259_v49, %v2665_v12 }
 0x134   : > { %v783_v54 = vmul.f32 %v2257_v18, %v782_v46  ;;  %2137 = vmatmul.msk.f32.gmra.mxu1 %vm642_vm0, %v843_v51  ;;  %v855_v60 = vmul.f32 %v2677_v17, %v843_v51  ;;  %vm815_vm8 = vweird.f32 %v2259_v49 }
 0x135   : > { %2135 = vmatmul.msk.f32.gmra.mxu0 %vm642_vm0, %v841_v43  ;;  %v853_v56 = vmul.f32 %v2677_v17, %v841_v43  ;;  %v807_v59 = vsel %vm806_vm5, %v2255_v13, %v803_v50  ;;  %v875_v62 = vsel %vm642_vm0, %v857_v52, 0.0  ;;  %v810_v48 = vmul.f32 %v2259_v49, %v809_v55  ;;  %vm816_vm10 = vmor %vm814_vm9, %vm815_vm8 }
 0x136   : > { %v787_v63 = vsel %vm786_vm7, %v2257_v18, %v783_v54  ;;  %v824_v53 = vmul.f32 %v807_v59, %v2576_v57  ;;  %v869_v1 = vsel %vm642_vm0, %v855_v60, 0.0 }
 0x137   : > { %v863_v0 = vsel %vm642_vm0, %v853_v56, 0.0  ;;  %v822_v2 = vmul.f32 %v787_v63, %v2565_v47  ;;  %v811_v4 = vmul.f32 0.5, %v810_v48  ;;  %876 = vadd.xlane.f32.xlu0 %v875_v62 }
 0x138   : > { %864 = vadd.xlane.f32.xlu2 %v863_v0  ;;  %v835_v5 = vmul.f32 %v2645_v61, %v824_v53  ;;  %870 = vadd.xlane.f32.xlu1 %v869_v1 }
 0x139   : > { %v833_v6 = vmul.f32 %v2645_v61, %v822_v2  ;;  %v812_v7 = vsub.f32 1.5, %v811_v4 }
 0x13a   : > { %v846_v8 = vadd.f32 %v2652_v3, %v835_v5 }
 0x13b   : > { %v844_v9 = vadd.f32 %v2652_v3, %v833_v6  ;;  %v813_v30 = vmul.f32 %v2259_v49, %v812_v7  ;;  %v2387_v6 = vmov 0  }
 0x13c   : > { %2140 = vmatmul.msk.f32.vlgmr.msra.gmra.mxu3 %vm642_vm0, %v846_v8  ;;  %v858_v47 = vmul.f32 %v2677_v17, %v846_v8  ;;  %2142 = vmatmul.msk.f32.vlgmr.msrb.gmra.mxu1 %vm642_vm0, %v2669_v15 }
 0x13d   : > { %2138 = vmatmul.msk.f32.vlgmr.msra.gmra.mxu2 %vm642_vm0, %v844_v9  ;;  %v856_v57 = vmul.f32 %v2677_v17, %v844_v9  ;;  %v817_v10 = vsel %vm816_vm10, %v2259_v49, %v813_v30  ;;  %2230 = vset.pattern.permute.xlu2 %v2387_v6 }
 0x13e   : > { %v878_v11 = vsel %vm642_vm0, %v858_v47, 0.0  ;;  %v825_v13 = vmul.f32 %v817_v10, %v2578_v58  ;;  %2229 = vset.pattern.permute.xlu1 %v2387_v6  ;;  %2228 = vset.pattern.permute.xlu0 %v2387_v6 }
 0x13f   : > { %v872_v29 = vsel %vm642_vm0, %v856_v57, 0.0 }
 0x140   : > { %873 = vadd.xlane.f32.xlu2 %v872_v29  ;;  %879 = vadd.xlane.f32.xlu1 %v878_v11  ;;  %v836_v12 = vmul.f32 %v2645_v61, %v825_v13 }
 0x142   : > { %v847_v14 = vadd.f32 %v2652_v3, %v836_v12 }
 0x144   : > { %2141 = vmatmul.msk.f32.gmra.mxu3 %vm642_vm0, %v847_v14  ;;  %v859_v15 = vmul.f32 %v2677_v17, %v847_v14  ;;  %2143 = vmatmul.msk.f32.gmra.mxu1 %vm642_vm0, %v841_v43 }
 0x145   : > { %2139 = vmatmul.msk.f32.gmra.mxu2 %vm642_vm0, %v845_v45 }
 0x146   : > { %v881_v18 = vsel %vm642_vm0, %v859_v15, 0.0 }
 0x148   : > { %882 = vadd.xlane.f32.xlu2 %v881_v18 }
 0x14c   : > { %2144 = vmatmul.msk.f32.gmra.mxu1 %vm642_vm0, %v2672_v16 }
 0x154   : > { %2145 = vmatmul.msk.f32.gmra.mxu1 %vm642_vm0, %v843_v51 }
 0x15c   : > { %2146 = vmatmul.msk.f32.gmra.mxu1 %vm642_vm0, %v844_v9 }
 0x164   : > { %2147 = vmatmul.msk.f32.gmra.mxu1 %vm642_vm0, %v845_v45 }
 0x16c   : > { %2148 = vmatmul.msk.f32.gmra.mxu1 %vm642_vm0, %v846_v8 }
 0x174   : > { %2149 = vmatmul.msk.f32.gmra.mxu1 %vm642_vm0, %v847_v14 }
 0x1a2   : > { %v868_v3 = vpop.xlane.xlu0 %867 }
 0x1a3   : > { %v862_v58 = vpop.xlane.xlu1 %861  ;;  %v890_v24 = vadd.f32 %v2234_v19, %v868_v3 }
 0x1a4   : > { %v888_v16 = vadd.f32 %v2234_v19, %v862_v58 }
 0x1a5   : > { %v899_v39 = vsel %vm896_vm11, %v890_v24, -inf }
 0x1a6   : > { %v897_v32 = vsel %vm896_vm11, %v888_v16, -inf }
 0x1aa   : > { %v877_v21 = vpop.xlane.xlu0 %876 }
 0x1ab   : > { %v865_v61 = vpop.xlane.xlu2 %864  ;;  %v871_v17 = vpop.xlane.xlu1 %870  ;;  %v893_v28 = vadd.f32 %v2234_v19, %v877_v21 }
 0x1ac   : > { %v889_v27 = vadd.f32 %v2234_v19, %v865_v61  ;;  %v891_v31 = vadd.f32 %v2234_v19, %v871_v17 }
 0x1ad   : > { %v903_v35 = vsel %vm896_vm11, %v893_v28, -inf }
 0x1ae   : > { %v898_v34 = vsel %vm896_vm11, %v889_v27, -inf  ;;  %v900_v40 = vsel %vm896_vm11, %v891_v31, -inf }
 0x1af   : > { %v904_v44 = vmax.f32 %v898_v34, %v903_v35 }
 0x1b3   : > { %v874_v20 = vpop.xlane.xlu2 %873  ;;  %v880_v25 = vpop.xlane.xlu1 %879 }
 0x1b4   : > { %v892_v26 = vadd.f32 %v2234_v19, %v874_v20  ;;  %v894_v22 = vadd.f32 %v2234_v19, %v880_v25 }
 0x1b6   : > { %v901_v42 = vsel %vm896_vm11, %v892_v26, -inf  ;;  %v905_v36 = vsel %vm896_vm11, %v894_v22, -inf }
 0x1b7   : > { %v902_v38 = vmax.f32 %v897_v32, %v901_v42  ;;  %v906_v45 = vmax.f32 %v899_v39, %v905_v36 }
 0x1b9   : > { %v909_v43 = vmax.f32 %v902_v38, %v904_v44 }
 0x1bb   : > { %v883_v33 = vpop.xlane.xlu2 %882 }
 0x1bc   : > { %v895_v37 = vadd.f32 %v2234_v19, %v883_v33 }
 0x1be   : > { %v907_v41 = vsel %vm896_vm11, %v895_v37, -inf }
 0x1bf   : > { %v908_v46 = vmax.f32 %v900_v40, %v907_v41 }
 0x1c1   : > { %v910_v49 = vmax.f32 %v906_v45, %v908_v46 }
 0x1c3   : > { %v911_v50 = vmax.f32 %v909_v43, %v910_v49 }
 0x1c5   : > { %v912_v51 = vrot.slane %v911_v50, 4 }
 0x1c7   : > { %v913_v52 = vmax.f32 %v911_v50, %v912_v51 }
 0x1c9   : > { %v914_v54 = vrot.slane %v913_v52, 2 }
 0x1cb   : > { %v915_v55 = vmax.f32 %v913_v52, %v914_v54 }
 0x1cd   : > { %v916_v56 = vrot.slane %v915_v55, 1 }
 0x1cf   : > { %v917_v59 = vmax.f32 %v915_v55, %v916_v56 }
 0x1d1   : > { %v918_v60 = vsub.f32 %v888_v16, %v917_v59  ;;  %v919_v62 = vsub.f32 %v889_v27, %v917_v59  ;;  %v920_v63 = vsub.f32 %v890_v24, %v917_v59  ;;  %v921_v48 = vsub.f32 %v891_v31, %v917_v59 }
 0x1d2   : > { %v922_v0 = vsub.f32 %v892_v26, %v917_v59  ;;  %v923_v4 = vsub.f32 %v893_v28, %v917_v59  ;;  %v924_v7 = vsub.f32 %v894_v22, %v917_v59  ;;  %v925_v9 = vsub.f32 %v895_v37, %v917_v59 }
 0x1d3   : > { %v926_v53 = vmul.f32 1.442695, %v918_v60  ;;  %v928_v1 = vmul.f32 1.442695, %v919_v62  ;;  %v930_v2 = vmul.f32 1.442695, %v920_v63  ;;  %v1034_v62 = vpop.f32.mrf.mxu0 }
 0x1d4   : > { %v932_v5 = vmul.f32 1.442695, %v921_v48  ;;  %v934_v8 = vmul.f32 1.442695, %v922_v0  ;;  %v936_v30 = vmul.f32 1.442695, %v923_v4  ;;  %v1040_v48 = vpop.f32.mrf.mxu1 }
 0x1d5   : > { %2260 = vpow2.f32 %v926_v53  ;;  %v938_v47 = vmul.f32 1.442695, %v924_v7  ;;  %v940_v11 = vmul.f32 1.442695, %v925_v9  ;;  %v2235_v0 = vld [vmem:[%s3299_s8] ss:$0 sm:$0xff] }
 0x1d6   : > { %2262 = vpow2.f32 %v928_v1  ;;  %v1046_v1 = vpop.f32.mrf.mxu2  ;;  %v1035_v4 = vadd.f32 %v2235_v0, %v1034_v62  ;;  %v1041_v7 = vadd.f32 %v2235_v0, %v1040_v48 }
 0x1d7   : > { %2264 = vpow2.f32 %v930_v2 }
 0x1d8   : > { %2266 = vpow2.f32 %v932_v5 }
 0x1d9   : > { %2268 = vpow2.f32 %v934_v8 }
 0x1da   : > { %2270 = vpow2.f32 %v936_v30 }
 0x1db   : > { %v2261_v57 = vpop.eup %2260  ;;  %2272 = vpow2.f32 %v938_v47  ;;  %v1037_v53 = vpop.f32.mrf.mxu0 }
 0x1dc   : > { %v2263_v10 = vpop.eup %2262  ;;  %v942_v29 = vsel %vm896_vm11, %v2261_v57, 0.0  ;;  %2274 = vpow2.f32 %v940_v11  ;;  %v1038_v2 = vadd.f32 %v2235_v0, %v1037_v53  ;;  %v1043_v30 = vpop.f32.mrf.mxu1  ;;  %v1194_v11 = vld [vmem:[%s3302_s11 + $0x10] sm:$0xff] }
 0x1dd   : > { %v2265_v13 = vpop.eup %2264  ;;  %v943_v12 = vsel %vm896_vm11, %v2263_v10, 0.0  ;;  %v1052_v47 = vpop.f32.mrf.mxu3 }
 0x1de   : > { %v2267_v14 = vpop.eup %2266  ;;  %v944_v15 = vadd.f32 %v943_v12, %v942_v29  ;;  %v945_v18 = vsel %vm896_vm11, %v2265_v13, 0.0 }
 0x1df   : > { %v2269_v58 = vpop.eup %2268  ;;  %v947_v3 = vsel %vm896_vm11, %v2267_v14, 0.0 }
 0x1e0   : > { %v946_v61 = vadd.f32 %v945_v18, %v944_v15  ;;  %v2271_v17 = vpop.eup %2270  ;;  %v949_v20 = vsel %vm896_vm11, %v2269_v58, 0.0  ;;  %v1044_v15 = vadd.f32 %v2235_v0, %v1043_v30 }
 0x1e1   : > { %v2273_v21 = vpop.eup %2272  ;;  %v951_v26 = vsel %vm896_vm11, %v2271_v17, 0.0 }
 0x1e2   : > { %v948_v19 = vadd.f32 %v947_v3, %v946_v61  ;;  %v2275_v16 = vpop.eup %2274  ;;  %v953_v28 = vsel %vm896_vm11, %v2273_v21, 0.0  ;;  %v1047_v61 = vadd.f32 %v2235_v0, %v1046_v1 }
 0x1e3   : > { %v955_v24 = vsel %vm896_vm11, %v2275_v16, 0.0 }
 0x1e4   : > { %v950_v25 = vadd.f32 %v949_v20, %v948_v19  ;;  %v1049_v19 = vpop.f32.mrf.mxu2 }
 0x1e6   : > { %v952_v27 = vadd.f32 %v951_v26, %v950_v25 }
 0x1e8   : > { %v954_v22 = vadd.f32 %v953_v28, %v952_v27 }
 0x1ea   : > { %v956_v31 = vadd.f32 %v955_v24, %v954_v22  ;;  %v1055_v22 = vpop.f32.mrf.mxu3 }
 0x1ec   : > { %v957_v42 = vrot.slane %v956_v31, 4 }
 0x1ee   : > { %v958_v32 = vadd.f32 %v957_v42, %v956_v31  ;;  %v1083_v31 = vpop.f32.mrf.mxu1 }
 0x1f0   : > { %v959_v33 = vrot.slane %v958_v32, 2 }
 0x1f2   : > { %v960_v34 = vadd.f32 %v959_v33, %v958_v32 }
 0x1f4   : > { %v961_v35 = vrot.slane %v960_v34, 1 }
 0x1f6   : > { %v962_v36 = vadd.f32 %v961_v35, %v960_v34  ;;  %v1053_v34 = vadd.f32 %v2235_v0, %v1052_v47  ;;  %v1056_v35 = vadd.f32 %v2235_v0, %v1055_v22  ;;  %v1271_v47 = vstv %s1270_s0 }
 0x1f7   : > { %vm1277_vm1 = vweird.f32 %v1271_v47 }
 0x1f8   : > { %2276 = vrcp.f32 %v962_v36  ;;  %v974_v40 = vand.u32 2147483648, %v962_v36  ;;  %v972_v44 = vand.u32 2147483647, %v962_v36  ;;  %vm968_vm13 = vweird.f32 %v962_v36 }
 0x1f9   : > { %2278 = vrcp.f32 %v1271_v47 }
 0x1fa   : > { %v975_v46 = vor.u32 1.1754944e-38, %v974_v40  ;;  %vm973_vm15 = vcmp.eq.f32.partialorder %v972_v44, 8.507059e+37 }
 0x1fe   : > { %v2277_v37 = vpop.eup %2276 }
 0x1ff   : > { %v964_v38 = vmul.f32 %v2277_v37, %v962_v36  ;;  %vm969_vm12 = vweird.f32 %v2277_v37 }
 0x200   : > { %vm970_vm14 = vmor %vm968_vm13, %vm969_vm12 }
 0x201   : > { %v965_v39 = vsub.f32 1.0, %v964_v38 }
 0x203   : > { %v966_v41 = vmul.f32 %v2277_v37, %v965_v39 }
 0x205   : > { %v967_v45 = vadd.f32 %v2277_v37, %v966_v41 }
 0x207   : > { %v971_v43 = vsel %vm970_vm14, %v2277_v37, %v967_v45 }
 0x208   : > { %v976_v49 = vsel %vm973_vm15, %v975_v46, %v971_v43  ;;  %v1086_v43 = vpop.f32.mrf.mxu1 }
 0x209   : > { %v979_v50 = vmul.f32 %v2265_v13, %v976_v49  ;;  %v978_v51 = vmul.f32 %v2263_v10, %v976_v49  ;;  %v977_v52 = vmul.f32 %v2261_v57, %v976_v49  ;;  %v980_v54 = vmul.f32 %v2267_v14, %v976_v49  ;;  %v1195_v10 = vld [vmem:[%s3302_s11 + $0x18] sm:$0xff]  ;;  %v1193_v14 = vld [vmem:[%s3302_s11 + $0x8] sm:$0xff] }
 0x20a   : > { %v981_v55 = vmul.f32 %v2269_v58, %v976_v49  ;;  %v984_v56 = vmul.f32 %v2275_v16, %v976_v49  ;;  %v982_v59 = vmul.f32 %v2271_v17, %v976_v49  ;;  %v983_v60 = vmul.f32 %v2273_v21, %v976_v49  ;;  %1236 = vmatpush.msrb.mxu2 %v1195_v10  ;;  %v1192_v58 = vld [vmem:[%s3302_s11] sm:$0xff] }
 0x20b   : > { %1119 = vperm.xlu2 %2230, %v979_v50   ;;  %1114 = vperm.xlu1 %2229, %v978_v51   ;;  %v1050_v16 = vadd.f32 %v2235_v0, %v1049_v19  ;;  %v2799_v50 = vld [vmem:[%s3301_s10] ss:$0 sm:$0xff] }
 0x20c   : > { %1109 = vperm.xlu0 %2228, %v977_v52   ;;  %1237 = vmatpush.msrb.mxu2 %v1194_v11  ;;  %v1087_v48 = vadd.f32 %v2799_v50, %v1086_v43 }
 0x20e   : > { %1238 = vmatpush.msrb.mxu2 %v1193_v14  ;;  %v1177_v0 = vmax.f32 %v1087_v48, 0.0 }
 0x210   : > { %1239 = vmatpush.msrb.mxu2 %v1192_v58 }
 0x213   : > { %1124 = vperm.xlu2 %2230, %v980_v54   ;;  %1129 = vperm.xlu1 %2229, %v981_v55   ;;  %v1084_v54 = vadd.f32 %v2799_v50, %v1083_v31 }
 0x214   : > { %1144 = vperm.xlu0 %2228, %v984_v56  }
 0x21b   : > { %1134 = vperm.xlu2 %2230, %v982_v59   ;;  %1139 = vperm.xlu1 %2229, %v983_v60   ;;  %v1089_v59 = vpop.f32.mrf.mxu1  ;;  %v1176_v60 = vmax.f32 %v1084_v54, 0.0 }
 0x223   : > { %v1092_v53 = vpop.f32.mrf.mxu1 }
 0x265   : > { %v1120_v63 = vpop.permute.xlu2 %1119 }
 0x266   : > { %v1149_v29 = vmul.f32 %v1120_v63, %v1041_v7  ;;  %v1093_v7 = vadd.f32 %v2799_v50, %v1092_v53 }
 0x268   : > { %v1158_v3 = vsel %vm642_vm0, %v1149_v29, 0.0 }
 0x26d   : > { %v1125_v5 = vpop.permute.xlu2 %1124 }
 0x26e   : > { %v1150_v17 = vmul.f32 %v1125_v5, %v1044_v15 }
 0x270   : > { %v1160_v27 = vsel %vm642_vm0, %v1150_v17, 0.0 }
 0x275   : > { %v1135_v26 = vpop.permute.xlu2 %1134 }
 0x276   : > { %v1152_v42 = vmul.f32 %v1135_v26, %v1050_v16 }
 0x278   : > { %v1164_v37 = vsel %vm642_vm0, %v1152_v42, 0.0 }
 0x27d   : > { %v1115_v6 = vpop.permute.xlu1 %1114 }
 0x27e   : > { %v1148_v8 = vmul.f32 %v1115_v6, %v1038_v2  ;;  %v1110_v9 = vpop.permute.xlu0 %1109  ;;  %v1090_v2 = vadd.f32 %v2799_v50, %v1089_v59  ;;  %v1095_v6 = vpop.f32.mrf.mxu1 }
 0x27f   : > { %v1147_v57 = vmul.f32 %v1110_v9, %v1035_v4  ;;  %v1096_v30 = vadd.f32 %v2799_v50, %v1095_v6 }
 0x280   : > { %v1156_v13 = vsel %vm642_vm0, %v1148_v8, 0.0  ;;  %v1178_v4 = vmax.f32 %v1090_v2, 0.0  ;;  %v1179_v8 = vmax.f32 %v1093_v7, 0.0 }
 0x281   : > { %v1155_v12 = vsel %vm642_vm0, %v1147_v57, 0.0  ;;  %v1992_v57 = vstv %s1991_s30  ;;  %v1180_v11 = vmax.f32 %v1096_v30, 0.0 }
 0x282   : > { %v1157_v18 = vadd.f32 %v1156_v13, %v1155_v12  ;;  %2280 = vrcp.f32 %v1992_v57  ;;  %v2279_v13 = vpop.eup %2278  ;;  %v2004_v17 = vand.u32 2147483648, %v1992_v57  ;;  %vm1998_vm3 = vweird.f32 %v1992_v57 }
 0x283   : > { %v1273_v15 = vmul.f32 %v2279_v13, %v1271_v47  ;;  %vm1278_vm2 = vweird.f32 %v2279_v13 }
 0x284   : > { %v1159_v20 = vadd.f32 %v1158_v3, %v1157_v18  ;;  %v1283_v18 = vand.u32 2147483648, %v1271_v47  ;;  %v1281_v3 = vand.u32 2147483647, %v1271_v47  ;;  %vm1279_vm5 = vmor %vm1277_vm1, %vm1278_vm2  ;;  %v2333_v47 = vld [vmem:[%s2519_s1 + $0x18] sm:$0xff] }
 0x285   : > { %v1130_v21 = vpop.permute.xlu1 %1129 }
 0x286   : > { %v1151_v25 = vmul.f32 %v1130_v21, %v1047_v61  ;;  %v1161_v24 = vadd.f32 %v1160_v27, %v1159_v20  ;;  %v1145_v33 = vpop.permute.xlu0 %1144  ;;  %v1098_v10 = vpop.f32.mrf.mxu1  ;;  %v1274_v61 = vsub.f32 1.0, %v1273_v15  ;;  %v2002_v21 = vand.u32 2147483647, %v1992_v57 }
 0x287   : > { %v1154_v38 = vmul.f32 %v1145_v33, %v1056_v35  ;;  %v1099_v14 = vadd.f32 %v2799_v50, %v1098_v10  ;;  %v1284_v16 = vor.u32 1.1754944e-38, %v1283_v18  ;;  %vm1282_vm6 = vcmp.eq.f32.partialorder %v1281_v3, 8.507059e+37 }
 0x288   : > { %v1162_v28 = vsel %vm642_vm0, %v1151_v25, 0.0  ;;  %v2281_v12 = vpop.eup %2280  ;;  %v1275_v26 = vmul.f32 %v2279_v13, %v1274_v61  ;;  %vm2003_vm8 = vcmp.eq.f32.partialorder %v2002_v21, 8.507059e+37 }
 0x289   : > { %v1163_v32 = vadd.f32 %v1162_v28, %v1161_v24  ;;  %v1168_v45 = vsel %vm642_vm0, %v1154_v38, 0.0  ;;  %v1994_v58 = vmul.f32 %v2281_v12, %v1992_v57  ;;  %vm1999_vm4 = vweird.f32 %v2281_v12 }
 0x28a   : > { %v1181_v25 = vmax.f32 %v1099_v14, 0.0  ;;  %v1276_v22 = vadd.f32 %v2279_v13, %v1275_v26  ;;  %vm2000_vm7 = vmor %vm1998_vm3, %vm1999_vm4  ;;  %v2005_v24 = vor.u32 1.1754944e-38, %v2004_v17  ;;  %v2334_v14 = vld [vmem:[%s2519_s1 + $0x20] sm:$0xff] }
 0x28b   : > { %v1165_v40 = vadd.f32 %v1164_v37, %v1163_v32  ;;  %v1995_v20 = vsub.f32 1.0, %v1994_v58 }
 0x28c   : > { %v1280_v32 = vsel %vm1279_vm5, %v2279_v13, %v1276_v22 }
 0x28d   : > { %v1140_v36 = vpop.permute.xlu1 %1139  ;;  %v1996_v27 = vmul.f32 %v2281_v12, %v1995_v20  ;;  %v1285_v33 = vsel %vm1282_vm6, %v1284_v16, %v1280_v32 }
 0x28e   : > { %v1153_v39 = vmul.f32 %v1140_v36, %v1053_v34  ;;  %v1101_v19 = vpop.f32.mrf.mxu1  ;;  %2192 = vpush %v1285_v33 }
 0x28f   : > { %v1997_v31 = vadd.f32 %v2281_v12, %v1996_v27  ;;  %v1102_v42 = vadd.f32 %v2799_v50, %v1101_v19  ;;  %v2335_v19 = vld [vmem:[%s2519_s1 + $0x28] sm:$0xff] }
 0x290   : > { %v1166_v41 = vsel %vm642_vm0, %v1153_v39, 0.0 }
 0x291   : > { %v1167_v44 = vadd.f32 %v1166_v41, %v1165_v40  ;;  %v2001_v34 = vsel %vm2000_vm7, %v2281_v12, %v1997_v31  ;;  %v1182_v36 = vmax.f32 %v1102_v42, 0.0 }
 0x292   : > { %v2006_v35 = vsel %vm2003_vm8, %v2005_v24, %v2001_v34  ;;  %v2337_v34 = vld [vmem:[%s2519_s1 + $0x38] sm:$0xff] }
 0x293   : > { %v1169_v46 = vadd.f32 %v1168_v45, %v1167_v44  ;;  %2194 = vpush %v2006_v35  ;;  %v2237_v44 = vld [vmem:[%s3303_s12] ss:$0 sm:$0xff] }
 0x295   : > { %v1170_v49 = vrot.slane %v1169_v46, 4 }
 0x296   : > { %v1104_v37 = vpop.f32.mrf.mxu1 }
 0x297   : > { %v1171_v51 = vadd.f32 %v1170_v49, %v1169_v46  ;;  %v1105_v39 = vadd.f32 %v2799_v50, %v1104_v37  ;;  %v2330_v50 = vld [vmem:[%s2519_s1] sm:$0xff] }
 0x299   : > { %v1172_v52 = vrot.slane %v1171_v51, 2  ;;  %v1183_v40 = vmax.f32 %v1105_v39, 0.0 }
 0x29b   : > { %v1173_v55 = vadd.f32 %v1172_v52, %v1171_v51 }
 0x29d   : > { %v1174_v56 = vrot.slane %v1173_v55, 1 }
 0x29f   : > { %v2802_v62 = vadd.f32 %v1174_v56, %v1173_v55 }
 0x2a1   : > { %v1184_v63 = vmul.f32 %v1176_v60, %v2802_v62  ;;  %v1185_v1 = vmul.f32 %v1177_v0, %v2802_v62  ;;  %v1186_v5 = vmul.f32 %v1178_v4, %v2802_v62  ;;  %v1187_v9 = vmul.f32 %v1179_v8, %v2802_v62  ;;  %v2332_v4 = vld [vmem:[%s2519_s1 + $0x10] sm:$0xff] }
 0x2a2   : > { %v1188_v29 = vmul.f32 %v1180_v11, %v2802_v62  ;;  %v1189_v28 = vmul.f32 %v1181_v25, %v2802_v62  ;;  %v1190_v38 = vmul.f32 %v1182_v36, %v2802_v62  ;;  %v1191_v41 = vmul.f32 %v1183_v40, %v2802_v62  ;;  %v2331_v62 = vld [vmem:[%s2519_s1 + $0x8] sm:$0xff] }
 0x2a3   : > { %2150 = vmatmul.msk.f32.vlgmr.msrb.gmra.mxu2 %vm642_vm0, %v1184_v63 }
 0x2ab   : > { %2151 = vmatmul.msk.f32.gmra.mxu2 %vm642_vm0, %v1185_v1 }
 0x2b3   : > { %2152 = vmatmul.msk.f32.gmra.mxu2 %vm642_vm0, %v1186_v5 }
 0x2bb   : > { %2153 = vmatmul.msk.f32.gmra.mxu2 %vm642_vm0, %v1187_v9 }
 0x2bf   : > { %s2193_s22 = spop %2192 }
 0x2c0   : > { %s1297_s2 = smul.f32 %s2193_s22, %s2812_s25  ;;  %s3262_s25 = scalar_lea.vmem %s3310_s19, %s2178_s28 }
 0x2c1   : > { %s1287_s6 = smul.f32 %s2193_s22, %s2810_s24 }
 0x2c2   : > { %v1298_v45 = vstv %s1297_s2 }
 0x2c3   : > { %2154 = vmatmul.msk.f32.gmra.mxu2 %vm642_vm0, %v1188_v29  ;;  %v1288_v46 = vstv %s1287_s6  ;;  %v1299_v51 = vmul.f32 %v2330_v50, %v1298_v45  ;;  %v1300_v63 = vmul.f32 %v2331_v62, %v1298_v45  ;;  %v1301_v5 = vmul.f32 %v2332_v4, %v1298_v45 }
 0x2c4   : > { %v1302_v57 = vmul.f32 %v2333_v47, %v1298_v45  ;;  %v1303_v15 = vmul.f32 %v2334_v14, %v1298_v45  ;;  %v1304_v20 = vmul.f32 %v2335_v19, %v1298_v45  ;;  %v1306_v35 = vmul.f32 %v2337_v34, %v1298_v45  ;;  %s2195_s6 = spop %2194 }
 0x2c5   : > { %s2008_s23 = smul.f32 %s2195_s6, %s2814_s3 }
 0x2c6   : > { %s2018_s27 = smul.f32 %s2195_s6, %s2816_s26 }
 0x2cb   : > { %2155 = vmatmul.msk.f32.gmra.mxu2 %vm642_vm0, %v1189_v28  ;;  %v2336_v28 = vld [vmem:[%s2519_s1 + $0x30] sm:$0xff] }
 0x2cc   : > { %v1305_v22 = vmul.f32 %v2336_v28, %v1298_v45 }
 0x2d3   : > { %2156 = vmatmul.msk.f32.gmra.mxu2 %vm642_vm0, %v1190_v38 }
 0x2db   : > { %2157 = vmatmul.msk.f32.gmra.mxu2 %vm642_vm0, %v1191_v41 }
 0x326   : > { %v1241_v43 = vpop.f32.mrf.mxu2 }
 0x327   : > { %v1242_v49 = vadd.f32 %v2237_v44, %v1241_v43 }
 0x329   : > { %v1289_v52 = vmul.f32 %v1288_v46, %v1242_v49 }
 0x32b   : > { %v2845_v54 = vadd.f32 %v1299_v51, %v1289_v52 }
 0x32d   : > { %v1317_v55 = vsel %vm642_vm0, %v2845_v54, 0.0 }
 0x32e   : > { %v1244_v56 = vpop.f32.mrf.mxu2  ;;  %1318 = vadd.xlane.f32.xlu2 %v1317_v55 }
 0x32f   : > { %v1245_v59 = vadd.f32 %v2237_v44, %v1244_v56 }
 0x331   : > { %v1290_v60 = vmul.f32 %v1288_v46, %v1245_v59 }
 0x333   : > { %v2850_v48 = vadd.f32 %v1300_v63, %v1290_v60 }
 0x335   : > { %v1320_v0 = vsel %vm642_vm0, %v2850_v48, 0.0 }
 0x336   : > { %v1247_v53 = vpop.f32.mrf.mxu2  ;;  %1321 = vadd.xlane.f32.xlu1 %v1320_v0 }
 0x337   : > { %v1248_v1 = vadd.f32 %v2237_v44, %v1247_v53 }
 0x339   : > { %v1291_v2 = vmul.f32 %v1288_v46, %v1248_v1 }
 0x33b   : > { %v2855_v6 = vadd.f32 %v1301_v5, %v1291_v2 }
 0x33d   : > { %v1323_v7 = vsel %vm642_vm0, %v2855_v6, 0.0 }
 0x33e   : > { %v1250_v8 = vpop.f32.mrf.mxu2  ;;  %1324 = vadd.xlane.f32.xlu0 %v1323_v7 }
 0x33f   : > { %v1251_v9 = vadd.f32 %v2237_v44, %v1250_v8 }
 0x341   : > { %v1292_v30 = vmul.f32 %v1288_v46, %v1251_v9 }
 0x343   : > { %v2860_v10 = vadd.f32 %v1302_v57, %v1292_v30 }
 0x345   : > { %v1326_v11 = vsel %vm642_vm0, %v2860_v10, 0.0 }
 0x346   : > { %v1253_v29 = vpop.f32.mrf.mxu2  ;;  %1327 = vadd.xlane.f32.xlu2 %v1326_v11 }
 0x347   : > { %v1254_v13 = vadd.f32 %v2237_v44, %v1253_v29 }
 0x349   : > { %v1293_v12 = vmul.f32 %v1288_v46, %v1254_v13 }
 0x34b   : > { %v2865_v18 = vadd.f32 %v1303_v15, %v1293_v12  ;;  %v1518_v15 = vld [vmem:[%s3306_s15 + $0x18] sm:$0xff] }
 0x34c   : > { %1559 = vmatpush.msrb.mxu3 %v1518_v15 }
 0x34d   : > { %v1329_v58 = vsel %vm642_vm0, %v2865_v18, 0.0 }
 0x34e   : > { %v1256_v61 = vpop.f32.mrf.mxu2  ;;  %1330 = vadd.xlane.f32.xlu1 %v1329_v58  ;;  %v1517_v58 = vld [vmem:[%s3306_s15 + $0x10] sm:$0xff] }
 0x34f   : > { %v1257_v3 = vadd.f32 %v2237_v44, %v1256_v61  ;;  %1560 = vmatpush.msrb.mxu3 %v1517_v58  ;;  %v1516_v61 = vld [vmem:[%s3306_s15 + $0x8] sm:$0xff] }
 0x351   : > { %v1294_v17 = vmul.f32 %v1288_v46, %v1257_v3  ;;  %1561 = vmatpush.msrb.mxu3 %v1516_v61 }
 0x353   : > { %v2870_v21 = vadd.f32 %v1304_v20, %v1294_v17  ;;  %v1515_v17 = vld [vmem:[%s3306_s15] sm:$0xff] }
 0x354   : > { %1562 = vmatpush.msrb.mxu3 %v1515_v17 }
 0x355   : > { %v1332_v25 = vsel %vm642_vm0, %v2870_v21, 0.0 }
 0x356   : > { %v1259_v26 = vpop.f32.mrf.mxu2  ;;  %1333 = vadd.xlane.f32.xlu2 %v1332_v25 }
 0x357   : > { %v1260_v16 = vadd.f32 %v2237_v44, %v1259_v26 }
 0x359   : > { %v1295_v27 = vmul.f32 %v1288_v46, %v1260_v16 }
 0x35b   : > { %v2875_v24 = vadd.f32 %v1305_v22, %v1295_v27 }
 0x35d   : > { %v1335_v31 = vsel %vm642_vm0, %v2875_v24, 0.0 }
 0x35e   : > { %v1262_v42 = vpop.f32.mrf.mxu2  ;;  %1336 = vadd.xlane.f32.xlu1 %v1335_v31 }
 0x35f   : > { %v1263_v32 = vadd.f32 %v2237_v44, %v1262_v42 }
 0x361   : > { %v1296_v33 = vmul.f32 %v1288_v46, %v1263_v32 }
 0x363   : > { %v2880_v36 = vadd.f32 %v1306_v35, %v1296_v33 }
 0x365   : > { %v1338_v50 = vsel %vm642_vm0, %v2880_v36, 0.0 }
 0x3a1   : > { %v1319_v37 = vpop.xlane.xlu2 %1318 }
 0x3a2   : > { %v1341_v38 = vmul.f32 %v1319_v37, %v2537_v23 }
 0x3a4   : > { %v2884_v39 = vsub.f32 %v2845_v54, %v1341_v38 }
 0x3a6   : > { %v1357_v40 = vmul.f32 %v2884_v39, %v2884_v39 }
 0x3a8   : > { %v1365_v41 = vsel %vm642_vm0, %v1357_v40, 0.0 }
 0x3a9   : > { %v1322_v43 = vpop.xlane.xlu1 %1321  ;;  %1366 = vadd.xlane.f32.xlu0 %v1365_v41 }
 0x3aa   : > { %v1342_v44 = vmul.f32 %v1322_v43, %v2537_v23 }
 0x3ac   : > { %v2891_v46 = vsub.f32 %v2850_v48, %v1342_v44 }
 0x3ae   : > { %v1358_v45 = vmul.f32 %v2891_v46, %v2891_v46 }
 0x3b0   : > { %v1368_v49 = vsel %vm642_vm0, %v1358_v45, 0.0 }
 0x3b1   : > { %v1325_v51 = vpop.xlane.xlu0 %1324  ;;  %1369 = vadd.xlane.f32.xlu2 %v1368_v49  ;;  %1339 = vadd.xlane.f32.xlu0 %v1338_v50  ;;  %v2958_v49 = vld [vmem:[%s3304_s13] ss:$0 sm:$0xff] }
 0x3b2   : > { %v1343_v52 = vmul.f32 %v1325_v51, %v2537_v23 }
 0x3b4   : > { %v2900_v55 = vsub.f32 %v2855_v6, %v1343_v52 }
 0x3b6   : > { %v1359_v56 = vmul.f32 %v2900_v55, %v2900_v55 }
 0x3b8   : > { %v1371_v59 = vsel %vm642_vm0, %v1359_v56, 0.0  ;;  %v2964_v56 = vld [vmem:[%s3305_s14] ss:$0 sm:$0xff] }
 0x3b9   : > { %1372 = vadd.xlane.f32.xlu1 %v1371_v59  ;;  %v1328_v60 = vpop.xlane.xlu2 %1327 }
 0x3ba   : > { %v1344_v62 = vmul.f32 %v1328_v60, %v2537_v23 }
 0x3bc   : > { %v2907_v63 = vsub.f32 %v2860_v10, %v1344_v62 }
 0x3be   : > { %v1360_v0 = vmul.f32 %v2907_v63, %v2907_v63 }
 0x3c0   : > { %v1374_v53 = vsel %vm642_vm0, %v1360_v0, 0.0 }
 0x3c1   : > { %v1331_v1 = vpop.xlane.xlu1 %1330  ;;  %1375 = vadd.xlane.f32.xlu2 %v1374_v53 }
 0x3c2   : > { %v1345_v2 = vmul.f32 %v1331_v1, %v2537_v23 }
 0x3c4   : > { %v2914_v4 = vsub.f32 %v2865_v18, %v1345_v2 }
 0x3c6   : > { %v1361_v5 = vmul.f32 %v2914_v4, %v2914_v4 }
 0x3c8   : > { %v1377_v7 = vsel %vm642_vm0, %v1361_v5, 0.0 }
 0x3c9   : > { %1378 = vadd.xlane.f32.xlu0 %v1377_v7  ;;  %v1334_v8 = vpop.xlane.xlu2 %1333 }
 0x3ca   : > { %v1346_v9 = vmul.f32 %v1334_v8, %v2537_v23 }
 0x3cc   : > { %v2921_v30 = vsub.f32 %v2870_v21, %v1346_v9 }
 0x3ce   : > { %v1362_v47 = vmul.f32 %v2921_v30, %v2921_v30 }
 0x3d0   : > { %v1380_v57 = vsel %vm642_vm0, %v1362_v47, 0.0 }
 0x3d1   : > { %v1337_v11 = vpop.xlane.xlu1 %1336  ;;  %1381 = vadd.xlane.f32.xlu1 %v1380_v57 }
 0x3d2   : > { %v1347_v29 = vmul.f32 %v1337_v11, %v2537_v23 }
 0x3d4   : > { %v2928_v13 = vsub.f32 %v2875_v24, %v1347_v29 }
 0x3d6   : > { %v1363_v12 = vmul.f32 %v2928_v13, %v2928_v13 }
 0x3d8   : > { %v1383_v14 = vsel %vm642_vm0, %v1363_v12, 0.0 }
 0x3d9   : > { %1384 = vadd.xlane.f32.xlu2 %v1383_v14 }
 0x41c   : > { %v1367_v3 = vpop.xlane.xlu0 %1366 }
 0x41d   : > { %v1389_v19 = vmul.f32 %v1367_v3, %v2537_v23 }
 0x41f   : > { %v1397_v20 = vadd.f32 1e-05, %v1389_v19 }
 0x421   : > { %2282 = vrsqrt.f32 %v1397_v20  ;;  %vm1411_vm10 = vweird.f32 %v1397_v20 }
 0x424   : > { %v1340_v25 = vpop.xlane.xlu0 %1339  ;;  %v1370_v26 = vpop.xlane.xlu2 %1369 }
 0x425   : > { %v1348_v16 = vmul.f32 %v1340_v25, %v2537_v23  ;;  %v1390_v27 = vmul.f32 %v1370_v26, %v2537_v23 }
 0x427   : > { %v2283_v28 = vpop.eup %2282  ;;  %v2949_v22 = vsub.f32 %v2880_v36, %v1348_v16  ;;  %v1398_v31 = vadd.f32 1e-05, %v1390_v27 }
 0x428   : > { %v1406_v42 = vmul.f32 %v2283_v28, %v1397_v20  ;;  %vm1412_vm9 = vweird.f32 %v2283_v28 }
 0x429   : > { %2284 = vrsqrt.f32 %v1398_v31  ;;  %v1364_v32 = vmul.f32 %v2949_v22, %v2949_v22  ;;  %vm1413_vm11 = vmor %vm1411_vm10, %vm1412_vm9  ;;  %vm1421_vm13 = vweird.f32 %v1398_v31 }
 0x42a   : > { %v1407_v33 = vmul.f32 %v2283_v28, %v1406_v42 }
 0x42b   : > { %v1386_v34 = vsel %vm642_vm0, %v1364_v32, 0.0 }
 0x42c   : > { %v1408_v35 = vmul.f32 0.5, %v1407_v33  ;;  %v1373_v37 = vpop.xlane.xlu1 %1372  ;;  %1387 = vadd.xlane.f32.xlu0 %v1386_v34 }
 0x42d   : > { %v1391_v38 = vmul.f32 %v1373_v37, %v2537_v23 }
 0x42e   : > { %v1409_v40 = vsub.f32 1.5, %v1408_v35 }
 0x42f   : > { %v2285_v41 = vpop.eup %2284  ;;  %v1399_v43 = vadd.f32 1e-05, %v1391_v38 }
 0x430   : > { %v1410_v44 = vmul.f32 %v2283_v28, %v1409_v40  ;;  %v1416_v45 = vmul.f32 %v2285_v41, %v1398_v31  ;;  %vm1422_vm12 = vweird.f32 %v2285_v41 }
 0x431   : > { %2286 = vrsqrt.f32 %v1399_v43  ;;  %vm1423_vm14 = vmor %vm1421_vm13, %vm1422_vm12  ;;  %vm1431_vm1 = vweird.f32 %v1399_v43 }
 0x432   : > { %v1414_v50 = vsel %vm1413_vm11, %v2283_v28, %v1410_v44  ;;  %v1417_v51 = vmul.f32 %v2285_v41, %v1416_v45 }
 0x433   : > { %v1485_v52 = vmul.f32 %v1414_v50, %v2884_v39 }
 0x434   : > { %v1418_v59 = vmul.f32 0.5, %v1417_v51  ;;  %v1376_v60 = vpop.xlane.xlu2 %1375 }
 0x435   : > { %v1392_v62 = vmul.f32 %v1376_v60, %v2537_v23  ;;  %v1496_v0 = vmul.f32 %v2958_v49, %v1485_v52 }
 0x436   : > { %v1419_v53 = vsub.f32 1.5, %v1418_v59 }
 0x437   : > { %v2287_v1 = vpop.eup %2286  ;;  %v1400_v2 = vadd.f32 1e-05, %v1392_v62  ;;  %v1507_v5 = vadd.f32 %v2964_v56, %v1496_v0 }
 0x438   : > { %v1420_v7 = vmul.f32 %v2285_v41, %v1419_v53  ;;  %v1426_v39 = vmul.f32 %v2287_v1, %v1399_v43  ;;  %vm1432_vm15 = vweird.f32 %v2287_v1 }
 0x439   : > { %2288 = vrsqrt.f32 %v1400_v2  ;;  %2159 = vmatmul.msk.f32.vlgmr.msrb.gmra.mxu3 %vm642_vm0, %v1507_v5  ;;  %vm1433_vm2 = vmor %vm1431_vm1, %vm1432_vm15  ;;  %vm1441_vm4 = vweird.f32 %v1400_v2 }
 0x43a   : > { %v1424_v8 = vsel %vm1423_vm14, %v2285_v41, %v1420_v7  ;;  %v1427_v9 = vmul.f32 %v2287_v1, %v1426_v39 }
 0x43b   : > { %v1486_v47 = vmul.f32 %v1424_v8, %v2891_v46 }
 0x43c   : > { %v1428_v57 = vmul.f32 0.5, %v1427_v9  ;;  %v1379_v11 = vpop.xlane.xlu0 %1378 }
 0x43d   : > { %v1393_v29 = vmul.f32 %v1379_v11, %v2537_v23  ;;  %v1497_v12 = vmul.f32 %v2958_v49, %v1486_v47 }
 0x43e   : > { %v1429_v14 = vsub.f32 1.5, %v1428_v57 }
 0x43f   : > { %v2289_v15 = vpop.eup %2288  ;;  %v1401_v58 = vadd.f32 1e-05, %v1393_v29  ;;  %v1508_v61 = vadd.f32 %v2964_v56, %v1497_v12 }
 0x440   : > { %v1430_v3 = vmul.f32 %v2287_v1, %v1429_v14  ;;  %v1436_v17 = vmul.f32 %v2289_v15, %v1400_v2  ;;  %vm1442_vm3 = vweird.f32 %v2289_v15 }
 0x441   : > { %2290 = vrsqrt.f32 %v1401_v58  ;;  %2160 = vmatmul.msk.f32.gmra.mxu3 %vm642_vm0, %v1508_v61  ;;  %vm1443_vm5 = vmor %vm1441_vm4, %vm1442_vm3  ;;  %vm1451_vm7 = vweird.f32 %v1401_v58 }
 0x442   : > { %v1434_v46 = vsel %vm1433_vm2, %v2287_v1, %v1430_v3  ;;  %v1437_v19 = vmul.f32 %v2289_v15, %v1436_v17 }
 0x443   : > { %v1487_v20 = vmul.f32 %v1434_v46, %v2900_v55 }
 0x444   : > { %v1438_v25 = vmul.f32 0.5, %v1437_v19  ;;  %v1382_v26 = vpop.xlane.xlu1 %1381 }
 0x445   : > { %v1394_v16 = vmul.f32 %v1382_v26, %v2537_v23  ;;  %v1498_v27 = vmul.f32 %v2958_v49, %v1487_v20 }
 0x446   : > { %v1439_v28 = vsub.f32 1.5, %v1438_v25 }
 0x447   : > { %v2291_v31 = vpop.eup %2290  ;;  %v1402_v42 = vadd.f32 1e-05, %v1394_v16  ;;  %v1509_v32 = vadd.f32 %v2964_v56, %v1498_v27 }
 0x448   : > { %v1440_v33 = vmul.f32 %v2289_v15, %v1439_v28  ;;  %v1446_v34 = vmul.f32 %v2291_v31, %v1401_v58  ;;  %vm1452_vm6 = vweird.f32 %v2291_v31 }
 0x449   : > { %2292 = vrsqrt.f32 %v1402_v42  ;;  %2161 = vmatmul.msk.f32.gmra.mxu3 %vm642_vm0, %v1509_v32  ;;  %vm1453_vm8 = vmor %vm1451_vm7, %vm1452_vm6  ;;  %vm1461_vm10 = vweird.f32 %v1402_v42 }
 0x44a   : > { %v1444_v55 = vsel %vm1443_vm5, %v2289_v15, %v1440_v33  ;;  %v1447_v35 = vmul.f32 %v2291_v31, %v1446_v34 }
 0x44b   : > { %v1488_v37 = vmul.f32 %v1444_v55, %v2907_v63 }
 0x44c   : > { %v1448_v38 = vmul.f32 0.5, %v1447_v35  ;;  %v1385_v40 = vpop.xlane.xlu2 %1384 }
 0x44d   : > { %v1395_v41 = vmul.f32 %v1385_v40, %v2537_v23  ;;  %v1499_v43 = vmul.f32 %v2958_v49, %v1488_v37 }
 0x44e   : > { %v1449_v44 = vsub.f32 1.5, %v1448_v38  ;;  %v1915_v38 = vld [vmem:[%s3308_s17 + $0x38] sm:$0xff] }
 0x44f   : > { %v2293_v45 = vpop.eup %2292  ;;  %v1403_v50 = vadd.f32 1e-05, %v1395_v41  ;;  %v1510_v51 = vadd.f32 %v2964_v56, %v1499_v43  ;;  %1953 = vmatpush.msrb.mxu0 %v1915_v38  ;;  %v1914_v43 = vld [vmem:[%s3308_s17 + $0x30] sm:$0xff] }
 0x450   : > { %v1450_v52 = vmul.f32 %v2291_v31, %v1449_v44  ;;  %v1456_v59 = vmul.f32 %v2293_v45, %v1402_v42  ;;  %vm1462_vm9 = vweird.f32 %v2293_v45 }
 0x451   : > { %2294 = vrsqrt.f32 %v1403_v50  ;;  %2162 = vmatmul.msk.f32.gmra.mxu3 %vm642_vm0, %v1510_v51  ;;  %vm1463_vm11 = vmor %vm1461_vm10, %vm1462_vm9  ;;  %vm1471_vm13 = vweird.f32 %v1403_v50  ;;  %1954 = vmatpush.msrb.mxu0 %v1914_v43 }
 0x452   : > { %v1454_v63 = vsel %vm1453_vm8, %v2291_v31, %v1450_v52  ;;  %v1457_v60 = vmul.f32 %v2293_v45, %v1456_v59  ;;  %v1913_v52 = vld [vmem:[%s3308_s17 + $0x28] sm:$0xff] }
 0x453   : > { %v1489_v62 = vmul.f32 %v1454_v63, %v2914_v4  ;;  %1955 = vmatpush.msrb.mxu0 %v1913_v52 }
 0x454   : > { %v1458_v0 = vmul.f32 0.5, %v1457_v60  ;;  %v1912_v60 = vld [vmem:[%s3308_s17 + $0x20] sm:$0xff] }
 0x455   : > { %v1500_v53 = vmul.f32 %v2958_v49, %v1489_v62  ;;  %1956 = vmatpush.msrb.mxu0 %v1912_v60 }
 0x456   : > { %v1459_v1 = vsub.f32 1.5, %v1458_v0 }
 0x457   : > { %v2295_v2 = vpop.eup %2294  ;;  %v1511_v5 = vadd.f32 %v2964_v56, %v1500_v53 }
 0x458   : > { %v1460_v7 = vmul.f32 %v2293_v45, %v1459_v1  ;;  %v1466_v39 = vmul.f32 %v2295_v2, %v1403_v50  ;;  %vm1472_vm12 = vweird.f32 %v2295_v2 }
 0x459   : > { %2163 = vmatmul.msk.f32.gmra.mxu3 %vm642_vm0, %v1511_v5  ;;  %vm1473_vm14 = vmor %vm1471_vm13, %vm1472_vm12 }
 0x45a   : > { %v1464_v8 = vsel %vm1463_vm11, %v2293_v45, %v1460_v7  ;;  %v1467_v9 = vmul.f32 %v2295_v2, %v1466_v39 }
 0x45b   : > { %v1490_v47 = vmul.f32 %v1464_v8, %v2921_v30  ;;  %v1910_v8 = vld [vmem:[%s3308_s17 + $0x10] sm:$0xff] }
 0x45c   : > { %v1468_v57 = vmul.f32 0.5, %v1467_v9 }
 0x45d   : > { %v1501_v4 = vmul.f32 %v2958_v49, %v1490_v47 }
 0x45e   : > { %v1469_v11 = vsub.f32 1.5, %v1468_v57 }
 0x45f   : > { %v1512_v29 = vadd.f32 %v2964_v56, %v1501_v4 }
 0x460   : > { %v1470_v12 = vmul.f32 %v2295_v2, %v1469_v11 }
 0x461   : > { %2164 = vmatmul.msk.f32.gmra.mxu3 %vm642_vm0, %v1512_v29  ;;  %v1909_v29 = vld [vmem:[%s3308_s17 + $0x8] sm:$0xff] }
 0x462   : > { %v1474_v14 = vsel %vm1473_vm14, %v2295_v2, %v1470_v12  ;;  %v1911_v2 = vld [vmem:[%s3308_s17 + $0x18] sm:$0xff] }
 0x463   : > { %v1491_v15 = vmul.f32 %v1474_v14, %v2928_v13  ;;  %1957 = vmatpush.msrb.mxu0 %v1911_v2 }
 0x465   : > { %v1502_v58 = vmul.f32 %v2958_v49, %v1491_v15  ;;  %1958 = vmatpush.msrb.mxu0 %v1910_v8 }
 0x467   : > { %v1513_v61 = vadd.f32 %v2964_v56, %v1502_v58  ;;  %1959 = vmatpush.msrb.mxu0 %v1909_v29 }
 0x469   : > { %2165 = vmatmul.msk.f32.gmra.mxu3 %vm642_vm0, %v1513_v61  ;;  %v1908_v61 = vld [vmem:[%s3308_s17] sm:$0xff] }
 0x46a   : > { %1960 = vmatpush.msrb.mxu0 %v1908_v61 }
 0x49f   : > { %v1388_v30 = vpop.xlane.xlu0 %1387 }
 0x4a0   : > { %v1396_v3 = vmul.f32 %v1388_v30, %v2537_v23  ;;  %v3003_v23 = vld [vmem:[%s3307_s16] ss:$0 sm:$0xff] }
 0x4a2   : > { %v1404_v17 = vadd.f32 1e-05, %v1396_v3 }
 0x4a4   : > { %2296 = vrsqrt.f32 %v1404_v17  ;;  %vm1481_vm1 = vweird.f32 %v1404_v17 }
 0x4aa   : > { %v2297_v46 = vpop.eup %2296 }
 0x4ab   : > { %v1476_v19 = vmul.f32 %v2297_v46, %v1404_v17  ;;  %vm1482_vm15 = vweird.f32 %v2297_v46 }
 0x4ac   : > { %vm1483_vm2 = vmor %vm1481_vm1, %vm1482_vm15  ;;  %vm1920_vm1 = vcmask 523264  }
 0x4ad   : > { %v1477_v20 = vmul.f32 %v2297_v46, %v1476_v19 }
 0x4af   : > { %v1478_v25 = vmul.f32 0.5, %v1477_v20 }
 0x4b1   : > { %v1479_v26 = vsub.f32 1.5, %v1478_v25 }
 0x4b3   : > { %v1480_v16 = vmul.f32 %v2297_v46, %v1479_v26 }
 0x4b5   : > { %v1484_v13 = vsel %vm1483_vm2, %v2297_v46, %v1480_v16 }
 0x4b6   : > { %v1492_v27 = vmul.f32 %v1484_v13, %v2949_v22 }
 0x4b8   : > { %v1503_v28 = vmul.f32 %v2958_v49, %v1492_v27 }
 0x4ba   : > { %v1514_v31 = vadd.f32 %v2964_v56, %v1503_v28 }
 0x4bc   : > { %v1564_v42 = vpop.f32.mrf.mxu3  ;;  %2166 = vmatmul.msk.f32.gmra.mxu3 %vm642_vm0, %v1514_v31 }
 0x4bd   : > { %v3008_v32 = vadd.f32 %v3003_v23, %v1564_v42 }
 0x4bf   : > { %v3011_v33 = vmul.f32 0.70710677, %v3008_v32 }
 0x4c1   : > { %v1604_v22 = vand.u32 2147483647, %v3011_v33  ;;  %vm1868_vm14 = vcmp.ge.f32.partialorder %v3011_v33, 0.0 }
 0x4c3   : > { %v1612_v34 = vmul.f32 0.3275911, %v1604_v22  ;;  %v1820_v14 = vsub.f32 0.0, %v1604_v22 }
 0x4c4   : > { %v1567_v49 = vpop.f32.mrf.mxu3 }
 0x4c5   : > { %v1620_v55 = vadd.f32 1.0, %v1612_v34  ;;  %v3015_v35 = vadd.f32 %v3003_v23, %v1567_v49  ;;  %v1828_v46 = vmul.f32 %v1820_v14, %v1604_v22 }
 0x4c7   : > { %2298 = vrcp.f32 %v1620_v55  ;;  %v3018_v56 = vmul.f32 0.70710677, %v3015_v35  ;;  %v1639_v62 = vand.u32 2147483648, %v1620_v55  ;;  %v1637_v1 = vand.u32 2147483647, %v1620_v55 }
 0x4c8   : > { %vm1633_vm4 = vweird.f32 %v1620_v55 }
 0x4c9   : > { %v3021_v37 = vand.u32 2147483647, %v3018_v56  ;;  %v1640_v9 = vor.u32 1.1754944e-38, %v1639_v62  ;;  %vm1638_vm6 = vcmp.eq.f32.partialorder %v1637_v1, 8.507059e+37 }
 0x4cb   : > { %v1613_v40 = vmul.f32 0.3275911, %v3021_v37  ;;  %v1821_v26 = vsub.f32 0.0, %v3021_v37 }
 0x4cc   : > { %v1570_v41 = vpop.f32.mrf.mxu3 }
 0x4cd   : > { %v2299_v44 = vpop.eup %2298  ;;  %v3031_v45 = vadd.f32 %v3003_v23, %v1570_v41  ;;  %v3033_v51 = vadd.f32 1.0, %v1613_v40 }
 0x4ce   : > { %v1629_v50 = vmul.f32 %v2299_v44, %v1620_v55  ;;  %vm1634_vm3 = vweird.f32 %v2299_v44  ;;  %v1836_v55 = vmul.f32 1.442695, %v1828_v46 }
 0x4cf   : > { %v3039_v59 = vmul.f32 0.70710677, %v3031_v45  ;;  %2300 = vrcp.f32 %v3033_v51  ;;  %vm1635_vm5 = vmor %vm1633_vm4, %vm1634_vm3  ;;  %v1654_v27 = vand.u32 2147483648, %v3033_v51  ;;  %vm1648_vm8 = vweird.f32 %v3033_v51 }
 0x4d0   : > { %v1630_v63 = vsub.f32 1.0, %v1629_v50  ;;  %v1652_v34 = vand.u32 2147483647, %v3033_v51 }
 0x4d1   : > { %v3046_v0 = vand.u32 2147483647, %v3039_v59  ;;  %v1655_v52 = vor.u32 1.1754944e-38, %v1654_v27 }
 0x4d2   : > { %v1631_v53 = vmul.f32 %v2299_v44, %v1630_v63  ;;  %vm1653_vm10 = vcmp.eq.f32.partialorder %v1652_v34, 8.507059e+37 }
 0x4d3   : > { %v1614_v5 = vmul.f32 0.3275911, %v3046_v0 }
 0x4d4   : > { %v1632_v7 = vadd.f32 %v2299_v44, %v1631_v53  ;;  %v1573_v39 = vpop.f32.mrf.mxu3  ;;  %v1822_v53 = vsub.f32 0.0, %v3046_v0 }
 0x4d5   : > { %v3055_v47 = vadd.f32 1.0, %v1614_v5  ;;  %v3058_v57 = vadd.f32 %v3003_v23, %v1573_v39  ;;  %v2301_v4 = vpop.eup %2300 }
 0x4d6   : > { %v1636_v11 = vsel %vm1635_vm5, %v2299_v44, %v1632_v7  ;;  %v1644_v15 = vmul.f32 %v2301_v4, %v3033_v51  ;;  %vm1649_vm7 = vweird.f32 %v2301_v4  ;;  %v1829_v44 = vmul.f32 %v1821_v26, %v3021_v37 }
 0x4d7   : > { %v3063_v12 = vsel %vm1638_vm6, %v1640_v9, %v1636_v11  ;;  %2302 = vrcp.f32 %v3055_v47  ;;  %v3072_v3 = vmul.f32 0.70710677, %v3058_v57  ;;  %vm3087_vm9 = vmor %vm1648_vm8, %vm1649_vm7  ;;  %v1669_v39 = vand.u32 2147483648, %v3055_v47 }
 0x4d8   : > { %v1748_v58 = vmul.f32 1.0614054, %v3063_v12  ;;  %v1645_v30 = vsub.f32 1.0, %v1644_v15  ;;  %v1838_v2 = vmul.f32 1.442695, %v1829_v44  ;;  %vm1663_vm12 = vweird.f32 %v3055_v47 }
 0x4d9   : > { %v3075_v20 = vand.u32 2147483647, %v3072_v3  ;;  %v1667_v29 = vand.u32 2147483647, %v3055_v47  ;;  %v1830_v61 = vmul.f32 %v1822_v53, %v3046_v0  ;;  %v1670_v0 = vor.u32 1.1754944e-38, %v1669_v39 }
 0x4da   : > { %v1756_v17 = vadd.f32 -1.4531521, %v1748_v58  ;;  %v1646_v19 = vmul.f32 %v2301_v4, %v1645_v30 }
 0x4db   : > { %v1615_v28 = vmul.f32 0.3275911, %v3075_v20  ;;  %v1823_v30 = vsub.f32 0.0, %v3075_v20  ;;  %vm1668_vm15 = vcmp.eq.f32.partialorder %v1667_v29, 8.507059e+37 }
 0x4dc   : > { %v1764_v25 = vmul.f32 %v1756_v17, %v3063_v12  ;;  %v1576_v16 = vpop.f32.mrf.mxu3  ;;  %v1647_v42 = vadd.f32 %v2301_v4, %v1646_v19 }
 0x4dd   : > { %v2303_v13 = vpop.eup %2302  ;;  %v3082_v31 = vadd.f32 %v3003_v23, %v1576_v16  ;;  %v3091_v40 = vadd.f32 1.0, %v1615_v28  ;;  %v1588_v16 = vmul.f32 0.5, %v3008_v32  ;;  %v1831_v32 = vmul.f32 %v1823_v30, %v3075_v20 }
 0x4de   : > { %v1772_v22 = vadd.f32 1.4214138, %v1764_v25  ;;  %v1659_v49 = vmul.f32 %v2303_v13, %v3055_v47  ;;  %v1651_v51 = vsel %vm3087_vm9, %v2301_v4, %v1647_v42  ;;  %vm1664_vm11 = vweird.f32 %v2303_v13 }
 0x4df   : > { %v3094_v41 = vmul.f32 0.70710677, %v3082_v31  ;;  %2304 = vrcp.f32 %v3091_v40  ;;  %v3105_v1 = vsel %vm1653_vm10, %v1655_v52, %v1651_v51  ;;  %vm3120_vm13 = vmor %vm1663_vm12, %vm1664_vm11  ;;  %v1684_v44 = vand.u32 2147483648, %v3091_v40 }
 0x4e0   : > { %v1780_v43 = vmul.f32 %v1772_v22, %v3063_v12  ;;  %v1660_v50 = vsub.f32 1.0, %v1659_v49  ;;  %2306 = vpow2.f32 %v1836_v55  ;;  %v1749_v9 = vmul.f32 1.0614054, %v3105_v1 }
 0x4e1   : > { %v3102_v62 = vand.u32 2147483647, %v3094_v41  ;;  %v1840_v49 = vmul.f32 1.442695, %v1830_v61  ;;  %vm1678_vm2 = vweird.f32 %v3091_v40  ;;  %v1685_v29 = vor.u32 1.1754944e-38, %v1684_v44 }
 0x4e2   : > { %v1788_v63 = vadd.f32 -0.28449672, %v1780_v43  ;;  %v1661_v60 = vmul.f32 %v2303_v13, %v1660_v50  ;;  %v1757_v46 = vadd.f32 -1.4531521, %v1749_v9  ;;  %vm1869_vm10 = vcmp.ge.f32.partialorder %v3018_v56, 0.0 }
 0x4e3   : > { %v1616_v5 = vmul.f32 0.3275911, %v3102_v62  ;;  %v1824_v53 = vsub.f32 0.0, %v3102_v62 }
 0x4e4   : > { %v1796_v37 = vmul.f32 %v1788_v63, %v3063_v12  ;;  %v1579_v7 = vpop.f32.mrf.mxu3  ;;  %v1662_v4 = vadd.f32 %v2303_v13, %v1661_v60  ;;  %v1765_v22 = vmul.f32 %v1757_v46, %v3105_v1 }
 0x4e5   : > { %v3111_v8 = vadd.f32 %v3003_v23, %v1579_v7  ;;  %v3116_v14 = vadd.f32 1.0, %v1616_v5  ;;  %v3118_v15 = vpop.eup %2304  ;;  %v1682_v5 = vand.u32 2147483647, %v3091_v40  ;;  %v1842_v7 = vmul.f32 1.442695, %v1831_v32 }
 0x4e6   : > { %v1804_v11 = vadd.f32 0.2548296, %v1796_v37  ;;  %v1674_v47 = vmul.f32 %v3118_v15, %v3091_v40  ;;  %v1666_v25 = vsel %vm3120_vm13, %v2303_v13, %v1662_v4  ;;  %v2307_v26 = vpop.eup %2306  ;;  %v1773_v63 = vadd.f32 1.4214138, %v1765_v22 }
 0x4e7   : > { %v3127_v17 = vmul.f32 0.70710677, %v3111_v8  ;;  %2308 = vrcp.f32 %v3116_v14  ;;  %v3144_v34 = vsel %vm1668_vm15, %v1670_v0, %v1666_v25  ;;  %vm1679_vm3 = vweird.f32 %v3118_v15 }
 0x4e8   : > { %v1812_v19 = vmul.f32 %v1804_v11, %v3063_v12  ;;  %v1675_v28 = vsub.f32 1.0, %v1674_v47  ;;  %v3141_v12 = vmul.f32 0.5, %v3015_v35  ;;  %2310 = vpow2.f32 %v1838_v2  ;;  %vm3175_vm5 = vmor %vm1678_vm2, %vm1679_vm3 }
 0x4e9   : > { %v3138_v42 = vand.u32 2147483647, %v3127_v17  ;;  %v1750_v60 = vmul.f32 1.0614054, %v3144_v34  ;;  %v1781_v61 = vmul.f32 %v1773_v63, %v3105_v1  ;;  %v1699_v25 = vand.u32 2147483648, %v3116_v14 }
 0x4ea   : > { %v1852_v27 = vmul.f32 %v2307_v26, %v1812_v19  ;;  %v1676_v43 = vmul.f32 %v3118_v15, %v1675_v28  ;;  %v1832_v19 = vmul.f32 %v1824_v53, %v3102_v62  ;;  %vm1693_vm6 = vweird.f32 %v3116_v14 }
 0x4eb   : > { %v1617_v55 = vmul.f32 0.3275911, %v3138_v42  ;;  %v1758_v33 = vadd.f32 -1.4531521, %v1750_v60  ;;  %v1789_v0 = vadd.f32 -0.28449672, %v1781_v61 }
 0x4ec   : > { %v1860_v13 = vsub.f32 1.0, %v1852_v27  ;;  %v1582_v38 = vpop.f32.mrf.mxu3  ;;  %v1677_v11 = vadd.f32 %v3118_v15, %v1676_v43  ;;  %vm1683_vm8 = vcmp.eq.f32.partialorder %v1682_v5, 8.507059e+37  ;;  %v1700_v43 = vor.u32 1.1754944e-38, %v1699_v25 }
 0x4ed   : > { %v3151_v50 = vadd.f32 %v3003_v23, %v1582_v38  ;;  %v2309_v35 = vpop.eup %2308  ;;  %v3153_v52 = vadd.f32 1.0, %v1617_v55  ;;  %v1766_v27 = vmul.f32 %v1758_v33, %v3144_v34  ;;  %v1797_v32 = vmul.f32 %v1789_v0, %v3105_v1 }
 0x4ee   : > { %v1876_v51 = vsub.f32 0.0, %v1860_v13  ;;  %v1689_v20 = vmul.f32 %v2309_v35, %v3116_v14  ;;  %v2311_v39 = vpop.eup %2310  ;;  %vm1694_vm4 = vweird.f32 %v2309_v35  ;;  %v1681_v40 = vsel %vm3175_vm5, %v3118_v15, %v1677_v11 }
 0x4ef   : > { %v3160_v37 = vmul.f32 0.70710677, %v3151_v50  ;;  %2312 = vrcp.f32 %v3153_v52  ;;  %vm3188_vm7 = vmor %vm1693_vm6, %vm1694_vm4  ;;  %v1774_v55 = vadd.f32 1.4214138, %v1766_v27  ;;  %v3196_v38 = vsel %vm1683_vm8, %v1685_v29, %v1681_v40 }
 0x4f0   : > { %v1884_v2 = vsel %vm1868_vm14, %v1860_v13, %v1876_v51  ;;  %v1690_v4 = vsub.f32 1.0, %v1689_v20  ;;  %2314 = vpow2.f32 %v1840_v49  ;;  %v1844_v44 = vmul.f32 1.442695, %v1832_v19 }
 0x4f1   : > { %v1892_v9 = vadd.f32 1.0, %v1884_v2  ;;  %v3169_v58 = vand.u32 2147483647, %v3160_v37  ;;  %v1825_v51 = vsub.f32 0.0, %v3138_v42  ;;  %v1805_v60 = vadd.f32 0.2548296, %v1797_v32 }
 0x4f2   : > { %v1691_v46 = vmul.f32 %v2309_v35, %v1690_v4  ;;  %v1782_v20 = vmul.f32 %v1774_v55, %v3144_v34  ;;  %v1714_v49 = vand.u32 2147483648, %v3153_v52  ;;  %v1751_v53 = vmul.f32 1.0614054, %v3196_v38 }
 0x4f3   : > { %v1900_v30 = vmul.f32 %v1892_v9, %v1588_v16  ;;  %v1618_v26 = vmul.f32 0.3275911, %v3169_v58  ;;  %v1697_v16 = vand.u32 2147483647, %v3116_v14  ;;  %v1712_v5 = vand.u32 2147483647, %v3153_v52 }
 0x4f4   : > { %v1692_v62 = vadd.f32 %v2309_v35, %v1691_v46  ;;  %v1813_v9 = vmul.f32 %v1805_v60, %v3105_v1  ;;  %v1790_v4 = vadd.f32 -0.28449672, %v1782_v20  ;;  %v1759_v11 = vadd.f32 -1.4531521, %v1751_v53 }
 0x4f5   : > { %2167 = vmatmul.msk.f32.vlgmr.msrb.gmra.mxu0 %vm1920_vm1, %v1900_v30  ;;  %v2313_v28 = vpop.eup %2312  ;;  %v3192_v13 = vadd.f32 1.0, %v1618_v26  ;;  %vm1698_vm9 = vcmp.eq.f32.partialorder %v1697_v16, 8.507059e+37  ;;  %vm1708_vm12 = vweird.f32 %v3153_v52  ;;  %v1715_v47 = vor.u32 1.1754944e-38, %v1714_v49 }
 0x4f6   : > { %v1704_v14 = vmul.f32 %v2313_v28, %v3153_v52  ;;  %v1696_v15 = vsel %vm3188_vm7, %v2309_v35, %v1692_v62  ;;  %vm1709_vm11 = vweird.f32 %v2313_v28  ;;  %v2315_v61 = vpop.eup %2314  ;;  %v1853_v33 = vmul.f32 %v2311_v39, %v1813_v9 }
 0x4f7   : > { %2316 = vrcp.f32 %v3192_v13  ;;  %v3206_v2 = vsel %vm1698_vm9, %v1700_v43, %v1696_v15  ;;  %v1798_v30 = vmul.f32 %v1790_v4, %v3144_v34  ;;  %v1767_v25 = vmul.f32 %v1759_v11, %v3196_v38  ;;  %vm1710_vm13 = vmor %vm1708_vm12, %vm1709_vm11 }
 0x4f8   : > { %v1705_v63 = vsub.f32 1.0, %v1704_v14  ;;  %2318 = vpow2.f32 %v1842_v7  ;;  %v1752_v29 = vmul.f32 1.0614054, %v3206_v2  ;;  %v1833_v7 = vmul.f32 %v1825_v51, %v3138_v42 }
 0x4f9   : > { %2320 = vpow2.f32 %v1844_v44  ;;  %v1861_v0 = vsub.f32 1.0, %v1853_v33  ;;  %v1806_v27 = vadd.f32 0.2548296, %v1798_v30  ;;  %vm1713_vm14 = vcmp.eq.f32.partialorder %v1712_v5, 8.507059e+37 }
 0x4fa   : > { %v1706_v35 = vmul.f32 %v2313_v28, %v1705_v63  ;;  %v1760_v1 = vadd.f32 -1.4531521, %v1752_v29  ;;  %vm1870_vm15 = vcmp.ge.f32.partialorder %v3039_v59, 0.0  ;;  %v1729_v42 = vand.u32 2147483648, %v3192_v13 }
 0x4fb   : > { %v1775_v39 = vadd.f32 1.4214138, %v1767_v25  ;;  %v1877_v22 = vsub.f32 0.0, %v1861_v0  ;;  %v1814_v32 = vmul.f32 %v1806_v27, %v3144_v34  ;;  %v1727_v15 = vand.u32 2147483647, %v3192_v13 }
 0x4fc   : > { %v1707_v46 = vadd.f32 %v2313_v28, %v1706_v35  ;;  %v1768_v40 = vmul.f32 %v1760_v1, %v3206_v2  ;;  %vm1723_vm3 = vweird.f32 %v3192_v13  ;;  %v1730_v34 = vor.u32 1.1754944e-38, %v1729_v42 }
 0x4fd   : > { %v2317_v19 = vpop.eup %2316  ;;  %v1783_v43 = vmul.f32 %v1775_v39, %v3196_v38  ;;  %v1885_v60 = vsel %vm1869_vm10, %v1861_v0, %v1877_v22  ;;  %v1854_v20 = vmul.f32 %v2315_v61, %v1814_v32  ;;  %v1826_v56 = vsub.f32 0.0, %v3169_v58 }
 0x4fe   : > { %v1719_v26 = vmul.f32 %v2317_v19, %v3192_v13  ;;  %v2319_v16 = vpop.eup %2318  ;;  %v1711_v62 = vsel %vm1710_vm13, %v2313_v28, %v1707_v46  ;;  %v1776_v44 = vadd.f32 1.4214138, %v1768_v40  ;;  %vm1724_vm2 = vweird.f32 %v2317_v19 }
 0x4ff   : > { %v1716_v55 = vsel %vm1713_vm14, %v1715_v47, %v1711_v62  ;;  %v2321_v14 = vpop.eup %2320  ;;  %v1893_v49 = vadd.f32 1.0, %v1885_v60  ;;  %v1791_v28 = vadd.f32 -0.28449672, %v1783_v43  ;;  %v1862_v5 = vsub.f32 1.0, %v1854_v20  ;;  %vm1725_vm4 = vmor %vm1723_vm3, %vm1724_vm2 }
 0x500   : > { %v1720_v52 = vsub.f32 1.0, %v1719_v26  ;;  %v1753_v51 = vmul.f32 1.0614054, %v1716_v55  ;;  %v1784_v53 = vmul.f32 %v1776_v44, %v3206_v2  ;;  %vm1728_vm5 = vcmp.eq.f32.partialorder %v1727_v15, 8.507059e+37 }
 0x501   : > { %v1901_v4 = vmul.f32 %v1893_v49, %v3141_v12  ;;  %v1799_v11 = vmul.f32 %v1791_v28, %v3196_v38  ;;  %v1878_v61 = vsub.f32 0.0, %v1862_v5  ;;  %v1590_v1 = vmul.f32 0.5, %v3031_v45 }
 0x502   : > { %v1721_v63 = vmul.f32 %v2317_v19, %v1720_v52  ;;  %v1761_v35 = vadd.f32 -1.4531521, %v1753_v51  ;;  %v1792_v29 = vadd.f32 -0.28449672, %v1784_v53  ;;  %v1846_v26 = vmul.f32 1.442695, %v1833_v7 }
 0x503   : > { %2168 = vmatmul.msk.f32.gmra.mxu0 %vm1920_vm1, %v1901_v4  ;;  %v1807_v46 = vadd.f32 0.2548296, %v1799_v11  ;;  %v1886_v12 = vsel %vm1870_vm15, %v1862_v5, %v1878_v61  ;;  %v1834_v40 = vmul.f32 %v1826_v56, %v3169_v58  ;;  %vm1871_vm6 = vcmp.ge.f32.partialorder %v3072_v3, 0.0 }
 0x504   : > { %v1722_v9 = vadd.f32 %v2317_v19, %v1721_v63  ;;  %v1769_v33 = vmul.f32 %v1761_v35, %v1716_v55  ;;  %v1800_v13 = vmul.f32 %v1792_v29, %v3206_v2  ;;  %v1894_v27 = vadd.f32 1.0, %v1886_v12 }
 0x505   : > { %v1815_v42 = vmul.f32 %v1807_v46, %v3196_v38  ;;  %2322 = vpow2.f32 %v1846_v26  ;;  %v1848_v51 = vmul.f32 1.442695, %v1834_v40  ;;  %v1591_v28 = vmul.f32 0.5, %v3058_v57 }
 0x506   : > { %v1726_v30 = vsel %vm1725_vm4, %v2317_v19, %v1722_v9  ;;  %v1777_v47 = vadd.f32 1.4214138, %v1769_v33  ;;  %v1808_v39 = vadd.f32 0.2548296, %v1800_v13  ;;  %v1902_v52 = vmul.f32 %v1894_v27, %v1590_v1 }
 0x507   : > { %v1731_v25 = vsel %vm1728_vm5, %v1730_v34, %v1726_v30  ;;  %v1855_v22 = vmul.f32 %v2319_v16, %v1815_v42  ;;  %vm1872_vm7 = vcmp.ge.f32.partialorder %v3094_v41, 0.0  ;;  %2324 = vpow2.f32 %v1848_v51 }
 0x508   : > { %v1754_v0 = vmul.f32 1.0614054, %v1731_v25  ;;  %v1785_v19 = vmul.f32 %v1777_v47, %v1716_v55  ;;  %v1816_v32 = vmul.f32 %v1808_v39, %v3206_v2  ;;  %v1592_v56 = vmul.f32 0.5, %v3082_v31 }
 0x509   : > { %v1863_v7 = vsub.f32 1.0, %v1855_v22  ;;  %vm1873_vm8 = vcmp.ge.f32.partialorder %v3127_v17, 0.0  ;;  %v1593_v47 = vmul.f32 0.5, %v3111_v8  ;;  %vm1874_vm9 = vcmp.ge.f32.partialorder %v3160_v37, 0.0 }
 0x50a   : > { %v1762_v62 = vadd.f32 -1.4531521, %v1754_v0  ;;  %v1793_v15 = vadd.f32 -0.28449672, %v1785_v19  ;;  %v1856_v43 = vmul.f32 %v2321_v14, %v1816_v32  ;;  %v1594_v31 = vmul.f32 0.5, %v3151_v50 }
 0x50b   : > { %2169 = vmatmul.msk.f32.gmra.mxu0 %vm1920_vm1, %v1902_v52  ;;  %v1879_v38 = vsub.f32 0.0, %v1863_v7  ;;  %v2323_v2 = vpop.eup %2322 }
 0x50c   : > { %v1770_v45 = vmul.f32 %v1762_v62, %v1731_v25  ;;  %v1801_v59 = vmul.f32 %v1793_v15, %v1716_v55  ;;  %v1864_v63 = vsub.f32 1.0, %v1856_v43 }
 0x50d   : > { %v1887_v20 = vsel %vm1871_vm6, %v1863_v7, %v1879_v38 }
 0x50e   : > { %v1778_v44 = vadd.f32 1.4214138, %v1770_v45  ;;  %v1809_v60 = vadd.f32 0.2548296, %v1801_v59  ;;  %v1880_v16 = vsub.f32 0.0, %v1864_v63  ;;  %v1895_v53 = vadd.f32 1.0, %v1887_v20 }
 0x510   : > { %v1786_v58 = vmul.f32 %v1778_v44, %v1731_v25  ;;  %v1817_v49 = vmul.f32 %v1809_v60, %v1716_v55  ;;  %v1903_v34 = vmul.f32 %v1895_v53, %v1591_v28  ;;  %v1888_v5 = vsel %vm1872_vm7, %v1864_v63, %v1880_v16  ;;  %v2325_v55 = vpop.eup %2324  ;;  %v2241_v28 = vld [vmem:[%s3309_s18] ss:$0 sm:$0xff] }
 0x511   : > { %v1896_v3 = vadd.f32 1.0, %v1888_v5 }
 0x512   : > { %v1794_v35 = vadd.f32 -0.28449672, %v1786_v58  ;;  %v1857_v14 = vmul.f32 %v2323_v2, %v1817_v49 }
 0x513   : > { %2170 = vmatmul.msk.f32.gmra.mxu0 %vm1920_vm1, %v1903_v34  ;;  %v1904_v61 = vmul.f32 %v1896_v3, %v1592_v56  ;;  %v2019_v34 = vstv %s2018_s27 }
 0x514   : > { %v1802_v9 = vmul.f32 %v1794_v35, %v1731_v25  ;;  %v1865_v4 = vsub.f32 1.0, %v1857_v14  ;;  %v2009_v14 = vstv %s2008_s23 }
 0x516   : > { %v1810_v11 = vadd.f32 0.2548296, %v1802_v9  ;;  %v1881_v29 = vsub.f32 0.0, %v1865_v4 }
 0x518   : > { %v1818_v33 = vmul.f32 %v1810_v11, %v1731_v25  ;;  %v1889_v41 = vsel %vm1873_vm8, %v1865_v4, %v1881_v29 }
 0x519   : > { %v1897_v46 = vadd.f32 1.0, %v1889_v41 }
 0x51a   : > { %v1858_v57 = vmul.f32 %v2325_v55, %v1818_v33  ;;  %v2020_v33 = vmul.f32 %v2019_v34, %v2845_v54  ;;  %v2021_v54 = vmul.f32 %v2019_v34, %v2850_v48 }
 0x51b   : > { %2171 = vmatmul.msk.f32.gmra.mxu0 %vm1920_vm1, %v1904_v61  ;;  %v1905_v1 = vmul.f32 %v1897_v46, %v1593_v47 }
 0x51c   : > { %v1866_v30 = vsub.f32 1.0, %v1858_v57 }
 0x51e   : > { %v1882_v13 = vsub.f32 0.0, %v1866_v30 }
 0x520   : > { %v1890_v26 = vsel %vm1874_vm9, %v1866_v30, %v1882_v13 }
 0x521   : > { %v1898_v25 = vadd.f32 1.0, %v1890_v26 }
 0x523   : > { %2172 = vmatmul.msk.f32.gmra.mxu0 %vm1920_vm1, %v1905_v1  ;;  %v1906_v12 = vmul.f32 %v1898_v25, %v1594_v31  ;;  %v2022_v1 = vmul.f32 %v2019_v34, %v2855_v6 }
 0x52b   : > { %2173 = vmatmul.msk.f32.gmra.mxu0 %vm1920_vm1, %v1906_v12 }
 0x53f   : > { %v1585_v17 = vpop.f32.mrf.mxu3 }
 0x540   : > { %v1586_v0 = vadd.f32 %v3003_v23, %v1585_v17  ;;  %v2023_v17 = vmul.f32 %v2019_v34, %v2860_v10 }
 0x542   : > { %v1603_v27 = vmul.f32 0.70710677, %v1586_v0  ;;  %v1595_v11 = vmul.f32 0.5, %v1586_v0 }
 0x544   : > { %v1611_v42 = vand.u32 2147483647, %v1603_v27  ;;  %vm1875_vm14 = vcmp.ge.f32.partialorder %v1603_v27, 0.0 }
 0x546   : > { %v1619_v39 = vmul.f32 0.3275911, %v1611_v42  ;;  %v1827_v45 = vsub.f32 0.0, %v1611_v42 }
 0x548   : > { %v1627_v19 = vadd.f32 1.0, %v1619_v39  ;;  %v1835_v59 = vmul.f32 %v1827_v45, %v1611_v42  ;;  %v2024_v39 = vmul.f32 %v2019_v34, %v2865_v18 }
 0x54a   : > { %2326 = vrcp.f32 %v1627_v19  ;;  %v1744_v62 = vand.u32 2147483648, %v1627_v19  ;;  %v1742_v22 = vand.u32 2147483647, %v1627_v19  ;;  %vm1738_vm11 = vweird.f32 %v1627_v19 }
 0x54b   : > { %v1850_v38 = vmul.f32 1.442695, %v1835_v59 }
 0x54c   : > { %v1745_v32 = vor.u32 1.1754944e-38, %v1744_v62  ;;  %vm1743_vm13 = vcmp.eq.f32.partialorder %v1742_v22, 8.507059e+37 }
 0x54d   : > { %2328 = vpow2.f32 %v1850_v38 }
 0x550   : > { %v2327_v8 = vpop.eup %2326 }
 0x551   : > { %v1734_v37 = vmul.f32 %v2327_v8, %v1627_v19  ;;  %vm1739_vm10 = vweird.f32 %v2327_v8 }
 0x552   : > { %vm1740_vm12 = vmor %vm1738_vm11, %vm1739_vm10 }
 0x553   : > { %v1735_v40 = vsub.f32 1.0, %v1734_v37  ;;  %v2329_v49 = vpop.eup %2328 }
 0x555   : > { %v1736_v52 = vmul.f32 %v2327_v8, %v1735_v40  ;;  %v2025_v40 = vmul.f32 %v2019_v34, %v2870_v21 }
 0x557   : > { %v1737_v50 = vadd.f32 %v2327_v8, %v1736_v52 }
 0x559   : > { %v1741_v15 = vsel %vm1740_vm12, %v2327_v8, %v1737_v50  ;;  %v2026_v50 = vmul.f32 %v2019_v34, %v2875_v24 }
 0x55a   : > { %v1746_v23 = vsel %vm1743_vm13, %v1745_v32, %v1741_v15 }
 0x55b   : > { %v1755_v7 = vmul.f32 1.0614054, %v1746_v23 }
 0x55d   : > { %v1763_v43 = vadd.f32 -1.4531521, %v1755_v7 }
 0x55f   : > { %v1771_v44 = vmul.f32 %v1763_v43, %v1746_v23 }
 0x561   : > { %v1779_v51 = vadd.f32 1.4214138, %v1771_v44 }
 0x563   : > { %v1787_v63 = vmul.f32 %v1779_v51, %v1746_v23 }
 0x565   : > { %v1795_v60 = vadd.f32 -0.28449672, %v1787_v63 }
 0x567   : > { %v1803_v58 = vmul.f32 %v1795_v60, %v1746_v23 }
 0x569   : > { %v1811_v20 = vadd.f32 0.2548296, %v1803_v58 }
 0x56b   : > { %v1819_v16 = vmul.f32 %v1811_v20, %v1746_v23  ;;  %v2027_v23 = vmul.f32 %v2019_v34, %v2880_v36 }
 0x56d   : > { %v1859_v2 = vmul.f32 %v2329_v49, %v1819_v16 }
 0x56f   : > { %v1867_v53 = vsub.f32 1.0, %v1859_v2 }
 0x571   : > { %v1883_v35 = vsub.f32 0.0, %v1867_v53 }
 0x572   : > { %v1962_v5 = vpop.f32.mrf.mxu0 }
 0x573   : > { %v1963_v9 = vadd.f32 %v2241_v28, %v1962_v5  ;;  %v1891_v4 = vsel %vm1875_vm14, %v1867_v53, %v1883_v35 }
 0x574   : > { %v1899_v3 = vadd.f32 1.0, %v1891_v4 }
 0x575   : > { %v2010_v29 = vmul.f32 %v2009_v14, %v1963_v9 }
 0x576   : > { %v1907_v55 = vmul.f32 %v1899_v3, %v1595_v11 }
 0x577   : > { %v2028_v56 = vadd.f32 %v2020_v33, %v2010_v29 }
 0x578   : > { %2174 = vmatmul.msk.f32.gmra.mxu0 %vm1920_vm1, %v1907_v55 }
 0x579   : > { %2036 = vst.msk [vmem:[%s3262_s25] sm:$0xff] %vm642_vm0, %v2028_v56 }
 0x580   : > { %v1965_v57 = vpop.f32.mrf.mxu0 }
 0x581   : > { %v1966_v61 = vadd.f32 %v2241_v28, %v1965_v57 }
 0x583   : > { %v2011_v41 = vmul.f32 %v2009_v14, %v1966_v61 }
 0x585   : > { %v2029_v30 = vadd.f32 %v2021_v54, %v2011_v41 }
 0x587   : > { %2037 = vst.msk [vmem:[%s3262_s25 + $0x8] sm:$0xff] %vm642_vm0, %v2029_v30 }
 0x588   : > { %v1968_v46 = vpop.f32.mrf.mxu0 }
 0x589   : > { %v1969_v13 = vadd.f32 %v2241_v28, %v1968_v46 }
 0x58b   : > { %v2012_v47 = vmul.f32 %v2009_v14, %v1969_v13 }
 0x58d   : > { %v2030_v26 = vadd.f32 %v2022_v1, %v2012_v47 }
 0x58f   : > { %2038 = vst.msk [vmem:[%s3262_s25 + $0x10] sm:$0xff] %vm642_vm0, %v2030_v26 }
 0x590   : > { %v1971_v25 = vpop.f32.mrf.mxu0 }
 0x591   : > { %v1972_v31 = vadd.f32 %v2241_v28, %v1971_v25 }
 0x593   : > { %v2013_v12 = vmul.f32 %v2009_v14, %v1972_v31 }
 0x595   : > { %v2031_v0 = vadd.f32 %v2023_v17, %v2013_v12 }
 0x597   : > { %2039 = vst.msk [vmem:[%s3262_s25 + $0x18] sm:$0xff] %vm642_vm0, %v2031_v0 }
 0x598   : > { %v1974_v48 = vpop.f32.mrf.mxu0 }
 0x599   : > { %v1975_v27 = vadd.f32 %v2241_v28, %v1974_v48 }
 0x59b   : > { %v2014_v42 = vmul.f32 %v2009_v14, %v1975_v27 }
 0x59d   : > { %v2032_v19 = vadd.f32 %v2024_v39, %v2014_v42 }
 0x59f   : > { %2040 = vst.msk [vmem:[%s3262_s25 + $0x20] sm:$0xff] %vm642_vm0, %v2032_v19 }
 0x5a0   : > { %v1977_v6 = vpop.f32.mrf.mxu0 }
 0x5a1   : > { %v1978_v8 = vadd.f32 %v2241_v28, %v1977_v6 }
 0x5a3   : > { %v2015_v37 = vmul.f32 %v2009_v14, %v1978_v8 }
 0x5a5   : > { %v2033_v62 = vadd.f32 %v2025_v40, %v2015_v37 }
 0x5a7   : > { %2041 = vst.msk [vmem:[%s3262_s25 + $0x28] sm:$0xff] %vm642_vm0, %v2033_v62 }
 0x5a8   : > { %v1980_v10 = vpop.f32.mrf.mxu0 }
 0x5a9   : > { %v1981_v52 = vadd.f32 %v2241_v28, %v1980_v10 }
 0x5ab   : > { %v2016_v22 = vmul.f32 %v2009_v14, %v1981_v52 }
 0x5ad   : > { %v2034_v32 = vadd.f32 %v2026_v50, %v2016_v22 }
 0x5af   : > { %2042 = vst.msk [vmem:[%s3262_s25 + $0x30] sm:$0xff] %vm642_vm0, %v2034_v32 }
 0x5f5   : > { %v1983_v18 = vpop.f32.mrf.mxu0 }
 0x5f6   : > { %v1984_v15 = vadd.f32 %v2241_v28, %v1983_v18 }
 0x5f8   : > { %v2017_v45 = vmul.f32 %v2009_v14, %v1984_v15 }
 0x5fa   : > { %v2035_v7 = vadd.f32 %v2027_v23, %v2017_v45 }
 0x5fc   : > { %2043 = vst.msk [vmem:[%s3262_s25 + $0x38] sm:$0xff] %vm642_vm0, %v2035_v7 }
 0x5fd PF: > { %s33_s20 = sadd.s32 1, %s2382_s20  }
 0x5fe   : > { %p30_p7 = scmp.ge.s32.totalorder %s33_s20, 4  }
 0x600   :  { %32 = sbr.rel (!%p30_p7) target bundleno = 7 (0x7), region = 135 }
 0x605   :  { %2065 = vsyncpa [#allocation4], 1 }
 0x606   :  { %2067 = vsyncpa [#allocation4 + $0x1], 1 }
 0x607   :  { %2068 = vsyncpa [#allocation6], 1 }

</bundles_post_ra>
